<compile_context>
chip_gen: v7x
topology: tpu7x:2x2x1
jax: 0.10.0
libtpu: 0.0.40
codegen_flags: <defaults>
</compile_context>

<pallas_src>
import functools

import jax
import jax.numpy as jnp
from jax.experimental import pallas as pl
from jax.experimental.pallas import tpu as pltpu

EPS = 1e-5     # torch.nn.LayerNorm default
TAIL = 16      # halo-tail block rows (multiple of the bf16 sublane tile (16, 128))


# ----------------------------------------------------------------------------
# small math helpers (used both inside the kernels and by the pure-JAX reference)
# ----------------------------------------------------------------------------
def _gelu(x, exact):
    if exact:   # F.gelu default (erf-based)
        return 0.5 * x * (1.0 + jax.lax.erf(x * 0.7071067811865476))
    # tanh approximation fallback (used only if Mosaic cannot lower lax.erf)
    c = 0.7978845608028654  # sqrt(2/pi)
    return 0.5 * x * (1.0 + jnp.tanh(c * (x + 0.044715 * (x * x * x))))


def _layer_norm_arr(h, gamma, beta, eps=EPS):
    mu = jnp.mean(h, axis=-1, keepdims=True)
    c = h - mu
    var = jnp.mean(c * c, axis=-1, keepdims=True)
    return c * jax.lax.rsqrt(var + eps) * gamma + beta


def _erf_lowers_in_pallas():
    """Probe whether lax.erf lowers through Mosaic; fall back to tanh-GELU if not."""
    def k(x_ref, o_ref):
        o_ref[...] = jax.lax.erf(x_ref[...])
    try:
        out = pl.pallas_call(
            k, out_shape=jax.ShapeDtypeStruct((8, 128), jnp.float32)
        )(jnp.zeros((8, 128), jnp.float32))
        jax.block_until_ready(out)
        return True
    except Exception:
        return False


def _pad_seq(x, halo, tile_l):
    # padded layout along L: [halo zero rows | L real rows | zero rows], total L + tile_l
    return jnp.pad(x, ((0, 0), (halo, tile_l - halo), (0, 0)))


# ----------------------------------------------------------------------------
# Kernel 1: one fused RNAResNetBlock
#   (mask -> conv1 -> LN1 -> GELU -> mask -> conv2 -> LN2 -> +identity -> GELU)
# ----------------------------------------------------------------------------
def _block_kernel(x_ref, xt_ref, m_ref, mt_ref,
                  w1_ref, g1_ref, b1_ref, w2_ref, g2_ref, b2_ref,
                  o_ref, *, exact_gelu):
    # x_ref  : (1, T, H)     padded activation rows [j*T, j*T+T)
    # xt_ref : (1, TAIL, H)  padded activation rows [j*T+T, j*T+T+TAIL)   (halo tail)
    # m_ref  : (1, T, 1), mt_ref: (1, TAIL, 1)   padded mask, same rows
    # w*_ref : (K, H, H) conv weights (bias=False);  g*/b*: (1, H) LayerNorm params
    # o_ref  : (1, T, H)     output rows [j*T, j*T+T) (unpadded coords)
    f32 = jnp.float32
    T = o_ref.shape[1]
    K = w1_ref.shape[0]
    p = (K - 1) // 2            # conv 'same' padding
    n1 = T + 2 * p              # conv1/LN1/GELU intermediate needs a +-p halo for conv2
    cdt = w1_ref.dtype          # MXU operand dtype (bf16 or f32)

    # extended (T + TAIL)-row window, upcast to f32 for the elementwise path
    xe = jnp.concatenate([x_ref[0], xt_ref[0]], axis=0).astype(f32)   # (T+TAIL, H)
    me = jnp.concatenate([m_ref[0], mt_ref[0]], axis=0).astype(f32)   # (T+TAIL, 1)

    # input = input * mask
    xm = (xe * me).astype(cdt)

    # conv1: K shifted MXU matmuls, f32 accumulation
    acc = jnp.dot(xm[0:n1], w1_ref[0], preferred_element_type=f32)
    for k in range(1, K):
        acc = acc + jnp.dot(xm[k:k + n1], w1_ref[k], preferred_element_type=f32)

    h = _layer_norm_arr(acc, g1_ref[0].astype(f32), b1_ref[0].astype(f32))
    h = _gelu(h, exact_gelu)
    h = (h * me[p:p + n1]).astype(cdt)             # out = out * mask

    # conv2
    acc = jnp.dot(h[0:T], w2_ref[0], preferred_element_type=f32)
    for k in range(1, K):
        acc = acc + jnp.dot(h[k:k + T], w2_ref[k], preferred_element_type=f32)

    out = _layer_norm_arr(acc, g2_ref[0].astype(f32), b2_ref[0].astype(f32))
    out = out + xe[2 * p:2 * p + T]                # residual (identity = unmasked input)
    out = _gelu(out, exact_gelu)
    o_ref[0] = out.astype(o_ref.dtype)


def rnaresnet_block(x, maskp, w1, g1, b1, w2, g2, b2, *, tile_l, exact_gelu,
                    vmem_limit_bytes):
    B, L, H = x.shape
    K = w1.shape[0]
    assert K % 2 == 1, "odd kernel_size ('same' conv)"
    halo = K - 1                               # 2 * padding
    T = tile_l
    assert L % T == 0 and T % TAIL == 0 and 2 * halo <= TAIL <= T
    nlt = L // T
    tb = T // TAIL
    xp = _pad_seq(x, halo, T)                  # (B, L + T, H), halo rows are zero

    kernel = functools.partial(_block_kernel, exact_gelu=exact_gelu)
    return pl.pallas_call(
        kernel,
        out_shape=jax.ShapeDtypeStruct((B, L, H), x.dtype),
        grid=(B, nlt),
        in_specs=[
            pl.BlockSpec((1, T, H), lambda b, j: (b, j, 0)),                # x tile
            pl.BlockSpec((1, TAIL, H), lambda b, j: (b, (j + 1) * tb, 0)),  # x halo tail
            pl.BlockSpec((1, T, 1), lambda b, j: (b, j, 0)),                # mask tile
            pl.BlockSpec((1, TAIL, 1), lambda b, j: (b, (j + 1) * tb, 0)),  # mask tail
            pl.BlockSpec((K, H, H), lambda b, j: (0, 0, 0)),                # conv1 w
            pl.BlockSpec((1, H), lambda b, j: (0, 0)),                      # ln1 gamma
            pl.BlockSpec((1, H), lambda b, j: (0, 0)),                      # ln1 beta
            pl.BlockSpec((K, H, H), lambda b, j: (0, 0, 0)),                # conv2 w
            pl.BlockSpec((1, H), lambda b, j: (0, 0)),                      # ln2 gamma
            pl.BlockSpec((1, H), lambda b, j: (0, 0)),                      # ln2 beta
        ],
        out_specs=pl.BlockSpec((1, T, H), lambda b, j: (b, j, 0)),
        compiler_params=pltpu.CompilerParams(
            dimension_semantics=("parallel", "parallel"),
            vmem_limit_bytes=vmem_limit_bytes,
        ),
    )(xp, xp, maskp, maskp,
      w1, g1.reshape(1, H), b1.reshape(1, H),
      w2, g2.reshape(1, H), b2.reshape(1, H))


# ----------------------------------------------------------------------------
# Kernel 2: mapping Linear (H -> H), L-tiled, lane-dense output
# ----------------------------------------------------------------------------
def _mapping_kernel(x_ref, w_ref, b_ref, o_ref):
    f32 = jnp.float32
    y = jnp.dot(x_ref[0], w_ref[...], preferred_element_type=f32) + b_ref[0].astype(f32)
    o_ref[0] = y.astype(o_ref.dtype)


def mapping_linear(x, w, b, *, tile_l, vmem_limit_bytes):
    B, L, H = x.shape
    O = w.shape[1]
    T = tile_l
    nlt = L // T
    return pl.pallas_call(
        _mapping_kernel,
        out_shape=jax.ShapeDtypeStruct((B, L, O), jnp.float32),
        grid=(B, nlt),
        in_specs=[
            pl.BlockSpec((1, T, H), lambda b, j: (b, j, 0)),
            pl.BlockSpec((H, O), lambda b, j: (0, 0)),
            pl.BlockSpec((1, O), lambda b, j: (0, 0)),
        ],
        out_specs=pl.BlockSpec((1, T, O), lambda b, j: (b, j, 0)),
        compiler_params=pltpu.CompilerParams(
            dimension_semantics=("parallel", "parallel"),
            vmem_limit_bytes=vmem_limit_bytes,
        ),
    )(x, w, b.reshape(1, O))


# ----------------------------------------------------------------------------
# RNAResNet forward
# ----------------------------------------------------------------------------
def rnaresnet_forward(input_ids, mask, params, *, tile_l, exact_gelu,
                      dtype=jnp.bfloat16, vmem_limit_bytes=64 * 1024 * 1024):
    mask_f = mask.astype(jnp.float32)[:, :, None]            # (B, L, 1)
    g0, b0 = params["ln0"]
    # Stem: LayerNorm(Embedding(ids)).  LayerNorm is row-wise, so normalize the tiny
    # (input_dim, H) table once and gather in plain JAX (exactly equivalent; keeps the
    # lane-sparse input_dim=4 contraction off the MXU).
    # TODO(synk): training-mode nn.Dropout(p=0.1) not implemented; inference => identity.
    tab = _layer_norm_arr(params["embedding"], g0, b0)
    x = (tab[input_ids] * mask_f).astype(dtype)
    K = params["blocks"][0][0].shape[0]
    maskp = _pad_seq(mask_f, K - 1, tile_l)                  # shared by every block
    for (w1, g1, b1, w2, g2, b2) in params["blocks"]:
        x = rnaresnet_block(x, maskp, w1.astype(dtype), g1, b1,
                            w2.astype(dtype), g2, b2,
                            tile_l=tile_l, exact_gelu=exact_gelu,
                            vmem_limit_bytes=vmem_limit_bytes)
    wm, bm = params["mapping"]
    return mapping_linear(x, wm.astype(dtype), bm, tile_l=tile_l,
                          vmem_limit_bytes=vmem_limit_bytes)


# ----------------------------------------------------------------------------
# pure-JAX (f32) reference of the PyTorch module, for the correctness check
# ----------------------------------------------------------------------------
def _conv1d_same_ref(x, w):
    K = w.shape[0]
    p = (K - 1) // 2
    L = x.shape[1]
    xp = jnp.pad(x, ((0, 0), (p, p), (0, 0)))
    return sum(jnp.einsum("blc,co->blo", xp[:, k:k + L, :], w[k]) for k in range(K))


def ref_forward(input_ids, mask, params, *, exact_gelu):
    m = mask.astype(jnp.float32)[:, :, None]
    g0, b0 = params["ln0"]
    x = _layer_norm_arr(params["embedding"][input_ids], g0, b0)   # embedding + LN
    x = x * m                                                      # dropout: identity (eval)
    for (w1, g1, b1, w2, g2, b2) in params["blocks"]:
        identity = x
        h = x * m
        h = _conv1d_same_ref(h, w1)
        h = _gelu(_layer_norm_arr(h, g1, b1), exact_gelu)
        h = h * m
        h = _conv1d_same_ref(h, w2)
        h = _layer_norm_arr(h, g2, b2)
        x = _gelu(h + identity, exact_gelu)
    wm, bm = params["mapping"]
    return x @ wm + bm


# ----------------------------------------------------------------------------
# parameter init (PyTorch-like shapes/dists; conv weights stored as (K, Cin, Cout))
# ----------------------------------------------------------------------------
def init_params(key, *, input_dim, hidden_dims, kernel_size):
    assert all(h == hidden_dims[0] for h in hidden_dims), "residual blocks need equal dims"
    H = hidden_dims[0]
    n_blocks = len(hidden_dims) - 1
    keys = jax.random.split(key, 5 + 6 * n_blocks)
    it = iter(keys)
    params = {}
    params["embedding"] = jax.random.normal(next(it), (input_dim, H), jnp.float32)
    params["ln0"] = (1.0 + 0.1 * jax.random.normal(next(it), (H,), jnp.float32),
                     0.05 * jax.random.normal(next(it), (H,), jnp.float32))
    bound_c = 1.0 / (H * kernel_size) ** 0.5
    blocks = []
    for _ in range(n_blocks):
        w1 = jax.random.uniform(next(it), (kernel_size, H, H), jnp.float32, -bound_c, bound_c)
        g1 = 1.0 + 0.1 * jax.random.normal(next(it), (H,), jnp.float32)
        b1 = 0.05 * jax.random.normal(next(it), (H,), jnp.float32)
        w2 = jax.random.uniform(next(it), (kernel_size, H, H), jnp.float32, -bound_c, bound_c)
        g2 = 1.0 + 0.1 * jax.random.normal(next(it), (H,), jnp.float32)
        b2 = 0.05 * jax.random.normal(next(it), (H,), jnp.float32)
        blocks.append((w1, g1, b1, w2, g2, b2))
    params["blocks"] = blocks
    bound_l = 1.0 / H ** 0.5
    params["mapping"] = (
        jax.random.uniform(next(it), (H, H), jnp.float32, -bound_l, bound_l),
        jax.random.uniform(next(it), (H,), jnp.float32, -bound_l, bound_l))
    return params


if __name__ == "__main__":
    # RNAResNet(input_dim=4, hidden_dims=[512]*8, kernel_size=3, padding=1, gelu)
    # at scaled-down demo shapes: hidden=128 (one lane tile), 2 residual blocks,
    # L=32 split into two 16-row tiles (exercises the cross-tile conv halo).
    B, L = 2, 32
    INPUT_DIM = 4                      # RNA vocabulary
    HIDDEN_DIMS = [128, 128, 128]      # stand-in for [512] * 8
    KSIZE = 3
    TILE_L = 16                        # sequence tile (multiple of 16); ~512 in production

    exact_gelu = _erf_lowers_in_pallas()

    key = jax.random.PRNGKey(0)
    k_ids, k_par = jax.random.split(key)
    input_ids = jax.random.randint(k_ids, (B, L), 0, INPUT_DIM, dtype=jnp.int32)
    lengths = jnp.array([L, 23], dtype=jnp.int32)
    mask = (jnp.arange(L)[None, :] < lengths[:, None]).astype(jnp.float32)   # (B, L)

    params = init_params(k_par, input_dim=INPUT_DIM, hidden_dims=HIDDEN_DIMS,
                         kernel_size=KSIZE)

    ref = ref_forward(input_ids, mask, params, exact_gelu=exact_gelu)

    # f32 run: tight structural check; bf16 run: the production configuration.
    for dtype, atol, rtol in ((jnp.float32, 1e-2, 1e-2), (jnp.bfloat16, 2e-1, 1e-1)):
        out = rnaresnet_forward(input_ids, mask, params, tile_l=TILE_L,
                                exact_gelu=exact_gelu, dtype=dtype)
        out = jax.block_until_ready(out)
        assert out.shape == (B, L, HIDDEN_DIMS[-1])
        assert jnp.allclose(out, ref, atol=atol, rtol=rtol), \
            f"mismatch vs reference ({dtype})"

    print("KERNEL_OK")
</pallas_src>

<mosaic_0001>
module attributes {stable_mosaic.version = 11 : i64} {
  func.func @k(%arg0: memref<8x128xf32, #tpu.memory_space<vmem>>, %arg1: memref<8x128xf32, #tpu.memory_space<vmem>>) attributes {dimension_semantics = [], scalar_prefetch = 0 : i64, scratch_operands = 0 : i64, tpu.core_type = #tpu.core_type<tc>} {
    %c0 = arith.constant 0 : index
    %c0_0 = arith.constant 0 : index
    %0 = vector.load %arg0[%c0, %c0_0] : memref<8x128xf32, #tpu.memory_space<vmem>>, vector<8x128xf32>
    %1 = math.erf %0 : vector<8x128xf32>
    %c0_1 = arith.constant 0 : index
    %c0_2 = arith.constant 0 : index
    %2 = vector.load %arg1[%c0_1, %c0_2] : memref<8x128xf32, #tpu.memory_space<vmem>>, vector<8x128xf32>
    tpu.vector_store %arg1[%c0_1, %c0_2], %1 {strides = array<i32>} : memref<8x128xf32, #tpu.memory_space<vmem>>, vector<8x128xf32>,
    return
  }
}

module attributes {stable_mosaic.version = 11 : i64} {
  func.func @_block_kernel(%arg0: i32, %arg1: i32, %arg2: memref<1x16x128xf32, #tpu.memory_space<vmem>>, %arg3: memref<1x16x128xf32, #tpu.memory_space<vmem>>, %arg4: memref<1x16x1xf32, #tpu.memory_space<vmem>>, %arg5: memref<1x16x1xf32, #tpu.memory_space<vmem>>, %arg6: memref<3x128x128xf32, #tpu.memory_space<vmem>>, %arg7: memref<1x128xf32, #tpu.memory_space<vmem>>, %arg8: memref<1x128xf32, #tpu.memory_space<vmem>>, %arg9: memref<3x128x128xf32, #tpu.memory_space<vmem>>, %arg10: memref<1x128xf32, #tpu.memory_space<vmem>>, %arg11: memref<1x128xf32, #tpu.memory_space<vmem>>, %arg12: memref<1x16x128xf32, #tpu.memory_space<vmem>>) attributes {dimension_semantics = [#tpu.dimension_semantics<parallel>, #tpu.dimension_semantics<parallel>], iteration_bounds = array<i64: 2, 2>, scalar_prefetch = 0 : i64, scratch_operands = 0 : i64, tpu.core_type = #tpu.core_type<tc>, window_params = [{transform_indices = @transform_0, window_bounds = array<i64: 1, 16, 128>}, {transform_indices = @transform_1, window_bounds = array<i64: 1, 16, 128>}, {transform_indices = @transform_2, window_bounds = array<i64: 1, 16, 1>}, {transform_indices = @transform_3, window_bounds = array<i64: 1, 16, 1>}, {pipeline_mode = #tpu.pipeline_mode<synchronous>, transform_indices = @transform_4, window_bounds = array<i64: 3, 128, 128>}, {pipeline_mode = #tpu.pipeline_mode<synchronous>, transform_indices = @transform_5, window_bounds = array<i64: 1, 128>}, {pipeline_mode = #tpu.pipeline_mode<synchronous>, transform_indices = @transform_6, window_bounds = array<i64: 1, 128>}, {pipeline_mode = #tpu.pipeline_mode<synchronous>, transform_indices = @transform_7, window_bounds = array<i64: 3, 128, 128>}, {pipeline_mode = #tpu.pipeline_mode<synchronous>, transform_indices = @transform_8, window_bounds = array<i64: 1, 128>}, {pipeline_mode = #tpu.pipeline_mode<synchronous>, transform_indices = @transform_9, window_bounds = array<i64: 1, 128>}, {transform_indices = @transform_10, window_bounds = array<i64: 1, 16, 128>}]} {
    %c0 = arith.constant 0 : index
    %c0_0 = arith.constant 0 : index
    %c0_1 = arith.constant 0 : index
    %0 = vector.load %arg2[%c0, %c0_0, %c0_1] : memref<1x16x128xf32, #tpu.memory_space<vmem>>, vector<1x16x128xf32>
    %1 = vector.shape_cast %0 : vector<1x16x128xf32> to vector<16x128xf32>
    %c0_2 = arith.constant 0 : index
    %c0_3 = arith.constant 0 : index
    %c0_4 = arith.constant 0 : index
    %2 = vector.load %arg3[%c0_2, %c0_3, %c0_4] : memref<1x16x128xf32, #tpu.memory_space<vmem>>, vector<1x16x128xf32>
    %3 = vector.shape_cast %2 : vector<1x16x128xf32> to vector<16x128xf32>
    %4 = tpu.concatenate %1, %3 in 0 : vector<16x128xf32>, vector<16x128xf32> -> vector<32x128xf32>
    %c0_5 = arith.constant 0 : index
    %c0_6 = arith.constant 0 : index
    %c0_7 = arith.constant 0 : index
    %5 = vector.load %arg4[%c0_5, %c0_6, %c0_7] : memref<1x16x1xf32, #tpu.memory_space<vmem>>, vector<1x16x1xf32>
    %6 = vector.shape_cast %5 : vector<1x16x1xf32> to vector<16x1xf32>
    %c0_8 = arith.constant 0 : index
    %c0_9 = arith.constant 0 : index
    %c0_10 = arith.constant 0 : index
    %7 = vector.load %arg5[%c0_8, %c0_9, %c0_10] : memref<1x16x1xf32, #tpu.memory_space<vmem>>, vector<1x16x1xf32>
    %8 = vector.shape_cast %7 : vector<1x16x1xf32> to vector<16x1xf32>
    %9 = tpu.concatenate %6, %8 in 0 : vector<16x1xf32>, vector<16x1xf32> -> vector<32x1xf32>
    %10 = vector.broadcast %9 : vector<32x1xf32> to vector<32x128xf32>
    %11 = arith.mulf %4, %10 : vector<32x128xf32>
    %12 = vector.extract_strided_slice %11 {offsets = [0, 0], sizes = [18, 128], strides = [1, 1]} : vector<32x128xf32> to vector<18x128xf32>
    %c0_11 = arith.constant 0 : index
    %c0_12 = arith.constant 0 : index
    %c0_13 = arith.constant 0 : index
    %13 = vector.load %arg6[%c0_11, %c0_12, %c0_13] : memref<3x128x128xf32, #tpu.memory_space<vmem>>, vector<1x128x128xf32>
    %14 = vector.shape_cast %13 : vector<1x128x128xf32> to vector<128x128xf32>
    %cst = arith.constant dense<0.000000e+00> : vector<18x128xf32>
    %15 = tpu.matmul %12, %14, %cst {dimension_numbers = #tpu.dot_dimension_numbers<[1], [0], [0], [1], [0, 0, 1, 1], [], []>} : vector<18x128xf32>, vector<128x128xf32>, vector<18x128xf32> -> vector<18x128xf32>
    %16 = vector.extract_strided_slice %11 {offsets = [1, 0], sizes = [18, 128], strides = [1, 1]} : vector<32x128xf32> to vector<18x128xf32>
    %c1 = arith.constant 1 : index
    %c0_14 = arith.constant 0 : index
    %c0_15 = arith.constant 0 : index
    %17 = vector.load %arg6[%c1, %c0_14, %c0_15] : memref<3x128x128xf32, #tpu.memory_space<vmem>>, vector<1x128x128xf32>
    %18 = vector.shape_cast %17 : vector<1x128x128xf32> to vector<128x128xf32>
    %cst_16 = arith.constant dense<0.000000e+00> : vector<18x128xf32>
    %19 = tpu.matmul %16, %18, %cst_16 {dimension_numbers = #tpu.dot_dimension_numbers<[1], [0], [0], [1], [0, 0, 1, 1], [], []>} : vector<18x128xf32>, vector<128x128xf32>, vector<18x128xf32> -> vector<18x128xf32>
    %20 = arith.addf %15, %19 : vector<18x128xf32>
    %21 = vector.extract_strided_slice %11 {offsets = [2, 0], sizes = [18, 128], strides = [1, 1]} : vector<32x128xf32> to vector<18x128xf32>
    %c2 = arith.constant 2 : index
    %c0_17 = arith.constant 0 : index
    %c0_18 = arith.constant 0 : index
    %22 = vector.load %arg6[%c2, %c0_17, %c0_18] : memref<3x128x128xf32, #tpu.memory_space<vmem>>, vector<1x128x128xf32>
    %23 = vector.shape_cast %22 : vector<1x128x128xf32> to vector<128x128xf32>
    %cst_19 = arith.constant dense<0.000000e+00> : vector<18x128xf32>
    %24 = tpu.matmul %21, %23, %cst_19 {dimension_numbers = #tpu.dot_dimension_numbers<[1], [0], [0], [1], [0, 0, 1, 1], [], []>} : vector<18x128xf32>, vector<128x128xf32>, vector<18x128xf32> -> vector<18x128xf32>
    %25 = arith.addf %20, %24 : vector<18x128xf32>
    %c0_20 = arith.constant 0 : index
    %c0_21 = arith.constant 0 : index
    %26 = vector.load %arg7[%c0_20, %c0_21] : memref<1x128xf32, #tpu.memory_space<vmem>>, vector<1x128xf32>
    %27 = vector.shape_cast %26 : vector<1x128xf32> to vector<128xf32>
    %c0_22 = arith.constant 0 : index
    %c0_23 = arith.constant 0 : index
    %28 = vector.load %arg8[%c0_22, %c0_23] : memref<1x128xf32, #tpu.memory_space<vmem>>, vector<1x128xf32>
    %29 = vector.shape_cast %28 : vector<1x128xf32> to vector<128xf32>
    %cst_24 = arith.constant dense<0.000000e+00> : vector<18xf32>
    %30 = vector.multi_reduction <add>, %25, %cst_24 [1] : vector<18x128xf32> to vector<18xf32>
    %31 = vector.shape_cast %30 : vector<18xf32> to vector<18x1xf32>
    %cst_25 = arith.constant 1.280000e+02 : f32
    %32 = vector.broadcast %cst_25 : f32 to vector<18x1xf32>
    %33 = arith.divf %31, %32 : vector<18x1xf32>
    %34 = vector.broadcast %33 : vector<18x1xf32> to vector<18x128xf32>
    %35 = arith.subf %25, %34 : vector<18x128xf32>
    %36 = arith.mulf %35, %35 : vector<18x128xf32>
    %cst_26 = arith.constant dense<0.000000e+00> : vector<18xf32>
    %37 = vector.multi_reduction <add>, %36, %cst_26 [1] : vector<18x128xf32> to vector<18xf32>
    %38 = vector.shape_cast %37 : vector<18xf32> to vector<18x1xf32>
    %cst_27 = arith.constant 1.280000e+02 : f32
    %39 = vector.broadcast %cst_27 : f32 to vector<18x1xf32>
    %40 = arith.divf %38, %39 : vector<18x1xf32>
    %cst_28 = arith.constant 9.99999974E-6 : f32
    %41 = vector.broadcast %cst_28 : f32 to vector<18x1xf32>
    %42 = arith.addf %40, %41 : vector<18x1xf32>
    %43 = math.rsqrt %42 : vector<18x1xf32>
    %44 = vector.broadcast %43 : vector<18x1xf32> to vector<18x128xf32>
    %45 = arith.mulf %35, %44 : vector<18x128xf32>
    %46 = vector.shape_cast %27 : vector<128xf32> to vector<1x128xf32>
    %47 = vector.broadcast %46 : vector<1x128xf32> to vector<18x128xf32>
    %48 = arith.mulf %45, %47 : vector<18x128xf32>
    %49 = vector.shape_cast %29 : vector<128xf32> to vector<1x128xf32>
    %50 = vector.broadcast %49 : vector<1x128xf32> to vector<18x128xf32>
    %51 = arith.addf %48, %50 : vector<18x128xf32>
    %cst_29 = arith.constant 5.000000e-01 : f32
    %52 = vector.broadcast %cst_29 : f32 to vector<18x128xf32>
    %53 = arith.mulf %52, %51 : vector<18x128xf32>
    %54 = arith.mulf %51, %51 : vector<18x128xf32>
    %55 = arith.mulf %54, %51 : vector<18x128xf32>
    %cst_30 = arith.constant 4.471500e-02 : f32
    %56 = vector.broadcast %cst_30 : f32 to vector<18x128xf32>
    %57 = arith.mulf %56, %55 : vector<18x128xf32>
    %58 = arith.addf %51, %57 : vector<18x128xf32>
    %cst_31 = arith.constant 0.797884583 : f32
    %59 = vector.broadcast %cst_31 : f32 to vector<18x128xf32>
    %60 = arith.mulf %59, %58 : vector<18x128xf32>
    %61 = math.tanh %60 : vector<18x128xf32>
    %cst_32 = arith.constant 1.000000e+00 : f32
    %62 = vector.broadcast %cst_32 : f32 to vector<18x128xf32>
    %63 = arith.addf %62, %61 : vector<18x128xf32>
    %64 = arith.mulf %53, %63 : vector<18x128xf32>
    %65 = vector.extract_strided_slice %9 {offsets = [1, 0], sizes = [18, 1], strides = [1, 1]} : vector<32x1xf32> to vector<18x1xf32>
    %66 = vector.broadcast %65 : vector<18x1xf32> to vector<18x128xf32>
    %67 = arith.mulf %64, %66 : vector<18x128xf32>
    %68 = vector.extract_strided_slice %67 {offsets = [0, 0], sizes = [16, 128], strides = [1, 1]} : vector<18x128xf32> to vector<16x128xf32>
    %c0_33 = arith.constant 0 : index
    %c0_34 = arith.constant 0 : index
    %c0_35 = arith.constant 0 : index
    %69 = vector.load %arg9[%c0_33, %c0_34, %c0_35] : memref<3x128x128xf32, #tpu.memory_space<vmem>>, vector<1x128x128xf32>
    %70 = vector.shape_cast %69 : vector<1x128x128xf32> to vector<128x128xf32>
    %cst_36 = arith.constant dense<0.000000e+00> : vector<16x128xf32>
    %71 = tpu.matmul %68, %70, %cst_36 {dimension_numbers = #tpu.dot_dimension_numbers<[1], [0], [0], [1], [0, 0, 1, 1], [], []>} : vector<16x128xf32>, vector<128x128xf32>, vector<16x128xf32> -> vector<16x128xf32>
    %72 = vector.extract_strided_slice %67 {offsets = [1, 0], sizes = [16, 128], strides = [1, 1]} : vector<18x128xf32> to vector<16x128xf32>
    %c1_37 = arith.constant 1 : index
    %c0_38 = arith.constant 0 : index
    %c0_39 = arith.constant 0 : index
    %73 = vector.load %arg9[%c1_37, %c0_38, %c0_39] : memref<3x128x128xf32, #tpu.memory_space<vmem>>, vector<1x128x128xf32>
    %74 = vector.shape_cast %73 : vector<1x128x128xf32> to vector<128x128xf32>
    %cst_40 = arith.constant dense<0.000000e+00> : vector<16x128xf32>
    %75 = tpu.matmul %72, %74, %cst_40 {dimension_numbers = #tpu.dot_dimension_numbers<[1], [0], [0], [1], [0, 0, 1, 1], [], []>} : vector<16x128xf32>, vector<128x128xf32>, vector<16x128xf32> -> vector<16x128xf32>
    %76 = arith.addf %71, %75 : vector<16x128xf32>
    %77 = vector.extract_strided_slice %67 {offsets = [2, 0], sizes = [16, 128], strides = [1, 1]} : vector<18x128xf32> to vector<16x128xf32>
    %c2_41 = arith.constant 2 : index
    %c0_42 = arith.constant 0 : index
    %c0_43 = arith.constant 0 : index
    %78 = vector.load %arg9[%c2_41, %c0_42, %c0_43] : memref<3x128x128xf32, #tpu.memory_space<vmem>>, vector<1x128x128xf32>
    %79 = vector.shape_cast %78 : vector<1x128x128xf32> to vector<128x128xf32>
    %cst_44 = arith.constant dense<0.000000e+00> : vector<16x128xf32>
    %80 = tpu.matmul %77, %79, %cst_44 {dimension_numbers = #tpu.dot_dimension_numbers<[1], [0], [0], [1], [0, 0, 1, 1], [], []>} : vector<16x128xf32>, vector<128x128xf32>, vector<16x128xf32> -> vector<16x128xf32>
    %81 = arith.addf %76, %80 : vector<16x128xf32>
    %c0_45 = arith.constant 0 : index
    %c0_46 = arith.constant 0 : index
    %82 = vector.load %arg10[%c0_45, %c0_46] : memref<1x128xf32, #tpu.memory_space<vmem>>, vector<1x128xf32>
    %83 = vector.shape_cast %82 : vector<1x128xf32> to vector<128xf32>
    %c0_47 = arith.constant 0 : index
    %c0_48 = arith.constant 0 : index
    %84 = vector.load %arg11[%c0_47, %c0_48] : memref<1x128xf32, #tpu.memory_space<vmem>>, vector<1x128xf32>
    %85 = vector.shape_cast %84 : vector<1x128xf32> to vector<128xf32>
    %cst_49 = arith.constant dense<0.000000e+00> : vector<16xf32>
    %86 = vector.multi_reduction <add>, %81, %cst_49 [1] : vector<16x128xf32> to vector<16xf32>
    %87 = vector.shape_cast %86 : vector<16xf32> to vector<16x1xf32>
    %cst_50 = arith.constant 1.280000e+02 : f32
    %88 = vector.broadcast %cst_50 : f32 to vector<16x1xf32>
    %89 = arith.divf %87, %88 : vector<16x1xf32>
    %90 = vector.broadcast %89 : vector<16x1xf32> to vector<16x128xf32>
    %91 = arith.subf %81, %90 : vector<16x128xf32>
    %92 = arith.mulf %91, %91 : vector<16x128xf32>
    %cst_51 = arith.constant dense<0.000000e+00> : vector<16xf32>
    %93 = vector.multi_reduction <add>, %92, %cst_51 [1] : vector<16x128xf32> to vector<16xf32>
    %94 = vector.shape_cast %93 : vector<16xf32> to vector<16x1xf32>
    %cst_52 = arith.constant 1.280000e+02 : f32
    %95 = vector.broadcast %cst_52 : f32 to vector<16x1xf32>
    %96 = arith.divf %94, %95 : vector<16x1xf32>
    %cst_53 = arith.constant 9.99999974E-6 : f32
    %97 = vector.broadcast %cst_53 : f32 to vector<16x1xf32>
    %98 = arith.addf %96, %97 : vector<16x1xf32>
    %99 = math.rsqrt %98 : vector<16x1xf32>
    %100 = vector.broadcast %99 : vector<16x1xf32> to vector<16x128xf32>
    %101 = arith.mulf %91, %100 : vector<16x128xf32>
    %102 = vector.shape_cast %83 : vector<128xf32> to vector<1x128xf32>
    %103 = vector.broadcast %102 : vector<1x128xf32> to vector<16x128xf32>
    %104 = arith.mulf %101, %103 : vector<16x128xf32>
    %105 = vector.shape_cast %85 : vector<128xf32> to vector<1x128xf32>
    %106 = vector.broadcast %105 : vector<1x128xf32> to vector<16x128xf32>
    %107 = arith.addf %104, %106 : vector<16x128xf32>
    %108 = vector.extract_strided_slice %4 {offsets = [2, 0], sizes = [16, 128], strides = [1, 1]} : vector<32x128xf32> to vector<16x128xf32>
    %109 = arith.addf %107, %108 : vector<16x128xf32>
    %cst_54 = arith.constant 5.000000e-01 : f32
    %110 = vector.broadcast %cst_54 : f32 to vector<16x128xf32>
    %111 = arith.mulf %110, %109 : vector<16x128xf32>
    %112 = arith.mulf %109, %109 : vector<16x128xf32>
    %113 = arith.mulf %112, %109 : vector<16x128xf32>
    %cst_55 = arith.constant 4.471500e-02 : f32
    %114 = vector.broadcast %cst_55 : f32 to vector<16x128xf32>
    %115 = arith.mulf %114, %113 : vector<16x128xf32>
    %116 = arith.addf %109, %115 : vector<16x128xf32>
    %cst_56 = arith.constant 0.797884583 : f32
    %117 = vector.broadcast %cst_56 : f32 to vector<16x128xf32>
    %118 = arith.mulf %117, %116 : vector<16x128xf32>
    %119 = math.tanh %118 : vector<16x128xf32>
    %cst_57 = arith.constant 1.000000e+00 : f32
    %120 = vector.broadcast %cst_57 : f32 to vector<16x128xf32>
    %121 = arith.addf %120, %119 : vector<16x128xf32>
    %122 = arith.mulf %111, %121 : vector<16x128xf32>
    %c0_58 = arith.constant 0 : index
    %c0_59 = arith.constant 0 : index
    %c0_60 = arith.constant 0 : index
    %123 = vector.load %arg12[%c0_58, %c0_59, %c0_60] : memref<1x16x128xf32, #tpu.memory_space<vmem>>, vector<1x16x128xf32>
    %124 = vector.shape_cast %123 : vector<1x16x128xf32> to vector<16x128xf32>
    %125 = vector.shape_cast %122 : vector<16x128xf32> to vector<1x16x128xf32>
    tpu.vector_store %arg12[%c0_58, %c0_59, %c0_60], %125 {strides = array<i32>} : memref<1x16x128xf32, #tpu.memory_space<vmem>>, vector<1x16x128xf32>,
    return
  }
  func.func @transform_0(%arg0: i32, %arg1: i32) -> (i32, i32, i32) {
    %c0_i32 = arith.constant 0 : i32
    %c0_i32_0 = arith.constant 0 : i32
    return %arg0, %arg1, %c0_i32 : i32, i32, i32
  }
  func.func @transform_1(%arg0: i32, %arg1: i32) -> (i32, i32, i32) {
    %c1_i32 = arith.constant 1 : i32
    %0 = arith.addi %arg1, %c1_i32 : i32
    %c1_i32_0 = arith.constant 1 : i32
    %1 = arith.muli %0, %c1_i32_0 : i32
    %c0_i32 = arith.constant 0 : i32
    %c0_i32_1 = arith.constant 0 : i32
    return %arg0, %1, %c0_i32 : i32, i32, i32
  }
  func.func @transform_2(%arg0: i32, %arg1: i32) -> (i32, i32, i32) {
    %c0_i32 = arith.constant 0 : i32
    %c0_i32_0 = arith.constant 0 : i32
    return %arg0, %arg1, %c0_i32 : i32, i32, i32
  }
  func.func @transform_3(%arg0: i32, %arg1: i32) -> (i32, i32, i32) {
    %c1_i32 = arith.constant 1 : i32
    %0 = arith.addi %arg1, %c1_i32 : i32
    %c1_i32_0 = arith.constant 1 : i32
    %1 = arith.muli %0, %c1_i32_0 : i32
    %c0_i32 = arith.constant 0 : i32
    %c0_i32_1 = arith.constant 0 : i32
    return %arg0, %1, %c0_i32 : i32, i32, i32
  }
  func.func @transform_4(%arg0: i32, %arg1: i32) -> (i32, i32, i32) {
    %c0_i32 = arith.constant 0 : i32
    %c0_i32_0 = arith.constant 0 : i32
    %c0_i32_1 = arith.constant 0 : i32
    %c0_i32_2 = arith.constant 0 : i32
    return %c0_i32, %c0_i32_0, %c0_i32_1 : i32, i32, i32
  }
  func.func @transform_5(%arg0: i32, %arg1: i32) -> (i32, i32) {
    %c0_i32 = arith.constant 0 : i32
    %c0_i32_0 = arith.constant 0 : i32
    %c0_i32_1 = arith.constant 0 : i32
    return %c0_i32, %c0_i32_0 : i32, i32
  }
  func.func @transform_6(%arg0: i32, %arg1: i32) -> (i32, i32) {
    %c0_i32 = arith.constant 0 : i32
    %c0_i32_0 = arith.constant 0 : i32
    %c0_i32_1 = arith.constant 0 : i32
    return %c0_i32, %c0_i32_0 : i32, i32
  }
  func.func @transform_7(%arg0: i32, %arg1: i32) -> (i32, i32, i32) {
    %c0_i32 = arith.constant 0 : i32
    %c0_i32_0 = arith.constant 0 : i32
    %c0_i32_1 = arith.constant 0 : i32
    %c0_i32_2 = arith.constant 0 : i32
    return %c0_i32, %c0_i32_0, %c0_i32_1 : i32, i32, i32
  }
  func.func @transform_8(%arg0: i32, %arg1: i32) -> (i32, i32) {
    %c0_i32 = arith.constant 0 : i32
    %c0_i32_0 = arith.constant 0 : i32
    %c0_i32_1 = arith.constant 0 : i32
    return %c0_i32, %c0_i32_0 : i32, i32
  }
  func.func @transform_9(%arg0: i32, %arg1: i32) -> (i32, i32) {
    %c0_i32 = arith.constant 0 : i32
    %c0_i32_0 = arith.constant 0 : i32
    %c0_i32_1 = arith.constant 0 : i32
    return %c0_i32, %c0_i32_0 : i32, i32
  }
  func.func @transform_10(%arg0: i32, %arg1: i32) -> (i32, i32, i32) {
    %c0_i32 = arith.constant 0 : i32
    %c0_i32_0 = arith.constant 0 : i32
    return %arg0, %arg1, %c0_i32 : i32, i32, i32
  }
}

</mosaic_0001>

<bundles_post_ra>
// kernel: tpu_custom_call.1
= control target key start
LH: loop header
LB: loop body
LE: loop exit
PB: predicated region body
PF: predicated region fallthrough
CT: control target
= control target key end

     0   :  { %6 = vsyncpa [#allocation3], 0  ;;  %s127_s0 = inlined_call_operand.hbm [shape: f32[8,128], index: 0, kind: input, shape index: {}]   ;;  %s128_s1 = inlined_call_operand.hbm [shape: f32[8,128], index: 1, kind: output, shape index: {}]  }
   0x1   :  { %7 = vsyncpa [#allocation4], 0  ;;  %s91_s6 = smov [#allocation2]   ;;  %s43_s10 = scalar_lea.hbm %s127_s0, 128 }
   0x2   :  { %s14_s7 = sshll.u32 %s91_s6, 4  ;;  %p44_p0 = scmp.ne.s32.totalorder %s127_s0, %s43_s10  ;;  %s15_s7 = int_to_ptr.vmem [resolvable:$true] %s14_s7 }
   0x3   :  { %p47_p1 = scmp.lt.u32.totalorder %s43_s10, %s127_s0 }
   0x5   :  { %p49_p2 = pnand %p47_p1, %p44_p0 }
   0x7   :  { %52 = shalt.err (!%p49_p2)
}
   0x8   :  { %s53_s15 = scalar_lea.vmem %s15_s7, 128  ;;  %p58_p4 = scmp.lt.s32.totalorder %s15_s7, %s15_s7 }
   0x9   :  { %p54_p3 = scmp.ne.s32.totalorder %s15_s7, %s53_s15  ;;  %p59_p5 = scmp.lt.s32.totalorder %s53_s15, %s53_s15 }
   0xb   :  { %p60_p6 = por %p59_p5, %p58_p4 }
   0xd   :  { %p61_p7 = pnand %p60_p6, %p54_p3 }
   0xf   :  { %64 = shalt.err (!%p61_p7)
}
  0x10   :  { %17 = dma.hbm_to_vmem [thread:$0]  %s127_s0, 128, %s15_s7, [#allocation3]  }
  0x11   :  { %87 = dma.done.wait [#allocation3], 128  }
  0x12   :  { %88 = vsyncadd [#allocation3], 4294967168  ;;  %v21_v0 = vld [vmem:[#allocation2] sm:$0xff]  ;;  %s92_s18 = smov [#allocation5]  }
  0x13   :  { %41 = verf.f32 %v21_v0  ;;  %s30_s19 = sshll.u32 %s92_s18, 4  ;;  %s31_s19 = int_to_ptr.vmem [resolvable:$true] %s30_s19 }
  0x14   :  { %s65_s20 = scalar_lea.vmem %s31_s19, 128  ;;  %p70_p9 = scmp.lt.s32.totalorder %s31_s19, %s31_s19 }
  0x15   :  { %p66_p8 = scmp.ne.s32.totalorder %s31_s19, %s65_s20  ;;  %p71_p10 = scmp.lt.s32.totalorder %s65_s20, %s65_s20 }
  0x17   :  { %p72_p11 = por %p71_p10, %p70_p9 }
  0x19   :  { %p73_p12 = pnand %p72_p11, %p66_p8 }
  0x1d   :  { %v42_v1 = vpop.eup %41 }
  0x1e   :  { %23 = vst [vmem:[#allocation5] sm:$0xff] %v42_v1 }
  0x1f   :  { %76 = shalt.err (!%p73_p12)
}
  0x20   :  { %s77_s0 = scalar_lea.hbm %s128_s1, 128 }
  0x21   :  { %p78_p13 = scmp.ne.s32.totalorder %s128_s1, %s77_s0  ;;  %p81_p0 = scmp.lt.u32.totalorder %s77_s0, %s128_s1 }
  0x23   :  { %p83_p1 = pnand %p81_p0, %p78_p13 }
  0x25   :  { %86 = shalt.err (!%p83_p1)
}
  0x26   :  { %33 = dma.vmem_to_hbm [thread:$0]  %s31_s19, 128, %s128_s1, [#allocation4]  }
  0x27   :  { %89 = dma.done.wait [#allocation4], 128  }
  0x28   :  { %90 = vsyncadd [#allocation4], 4294967168 }
  0x29   :  { %37 = vsyncpa [#allocation3], 1 }
  0x2a   :  { %38 = vsyncpa [#allocation4], 1 }

// kernel: tpu_custom_call.1
= control target key start
LH: loop header
LB: loop body
LE: loop exit
PB: predicated region body
PF: predicated region fallthrough
CT: control target
= control target key end

     0   :  { %s3682_s0 = inlined_call_operand.hbm [shape: f32[2,48,128], index: 0, kind: input, shape index: {}]   ;;  %s3683_s1 = inlined_call_operand.hbm [shape: f32[2,48,128], index: 1, kind: input, shape index: {}]   ;;  %s3684_s2 = inlined_call_operand.hbm [shape: f32[2,48,1], index: 2, kind: input, shape index: {}]   ;;  %s3685_s3 = inlined_call_operand.hbm [shape: f32[2,48,1], index: 3, kind: input, shape index: {}]   ;;  %s3686_s4 = inlined_call_operand.hbm [shape: f32[3,128,128], index: 4, kind: input, shape index: {}]   ;;  %s3687_s5 = inlined_call_operand.hbm [shape: f32[1,128], index: 5, kind: input, shape index: {}]   ;;  %s3688_s6 = inlined_call_operand.hbm [shape: f32[1,128], index: 6, kind: input, shape index: {}]   ;;  %s3689_s7 = inlined_call_operand.hbm [shape: f32[3,128,128], index: 7, kind: input, shape index: {}]   ;;  %s3690_s8 = inlined_call_operand.hbm [shape: f32[1,128], index: 8, kind: input, shape index: {}]   ;;  %s3691_s9 = inlined_call_operand.hbm [shape: f32[1,128], index: 9, kind: input, shape index: {}]   ;;  %s3692_s10 = inlined_call_operand.hbm [shape: f32[2,32,128], index: 10, kind: output, shape index: {}]  }
   0x1   :  { %3721 = sst [smem:[#allocation40_spill]] %s3682_s0 }
   0x2   :  { %3722 = sst [smem:[#allocation41_spill]] %s3683_s1 }
   0x3   :  { %3723 = sst [smem:[#allocation42_spill]] %s3684_s2 }
   0x4   :  { %3724 = sst [smem:[#allocation43_spill]] %s3685_s3 }
   0x5   :  { %3725 = sst [smem:[#allocation44_spill]] %s3686_s4 }
   0x6   :  { %3726 = sst [smem:[#allocation45_spill]] %s3687_s5 }
   0x7   :  { %3727 = sst [smem:[#allocation46_spill]] %s3688_s6 }
   0x8   :  { %3728 = sst [smem:[#allocation47_spill]] %s3689_s7 }
   0x9   :  { %3729 = sst [smem:[#allocation48_spill]] %s3690_s8 }
   0xa   :  { %3730 = sst [smem:[#allocation49_spill]] %s3691_s9 }
   0xb   :  { %3731 = sst [smem:[#allocation50_spill]] %s3692_s10 }
   0xc   :  { %15 = vsyncpa [#allocation3], 0 }
   0xd   :  { %17 = vsyncpa [#allocation3 + $0x1], 0 }
   0xe   :  { %18 = vsyncpa [#allocation6], 0 }
   0xf   :  { %20 = vsyncpa [#allocation6 + $0x1], 0 }
  0x10   :  { %21 = vsyncpa [#allocation9], 0 }
  0x11   :  { %23 = vsyncpa [#allocation9 + $0x1], 0 }
  0x12   :  { %24 = vsyncpa [#allocation12], 0 }
  0x13   :  { %25 = vsyncpa [#allocation15], 0 }
  0x14   :  { %26 = vsyncpa [#allocation18], 0 }
  0x15   :  { %27 = vsyncpa [#allocation4], 0 }
  0x16   :  { %29 = vsyncpa [#allocation4 + $0x1], 0  ;;  %s2949_s13 = smov 0   ;;  %s2951_s14 = smov 0  }
  0x17   :  { %s2953_s15 = smov 0   ;;  %s2955_s16 = smov 0  }
  0x18   :  { %s2957_s17 = smov 0   ;;  %s2959_s18 = smov 0  }
  0x19   :  { %s2961_s19 = smov 0   ;;  %s2963_s20 = smov 0  }
  0x1a   :  { %s2965_s21 = smov 0   ;;  %s2967_s22 = smov 0  }
  0x1b   :  { %s2969_s23 = smov 0  }
  0x1c LB: > { %3732 = sst [smem:[#allocation29_spill]] %s2845_s16  ;;  %s3005_s24 = sadd.s32 4294967295, %s2873_s23   ;;  %s2873_s23 = sphi %s2969_s23, %s35_s23   ;;  %s2869_s22 = sphi %s2967_s22, %s3802_s22   ;;  %s2865_s21 = sphi %s2965_s21, %s3801_s21   ;;  %s2861_s20 = sphi %s2963_s20, %s3800_s20   ;;  %s2857_s19 = sphi %s2961_s19, %s3799_s19   ;;  %s2853_s18 = sphi %s2959_s18, %s3798_s18   ;;  %s2849_s17 = sphi %s2957_s17, %s3797_s17   ;;  %s2845_s16 = sphi %s2955_s16, %s3796_s16   ;;  %s2841_s15 = sphi %s2953_s15, %s3805_s15   ;;  %s2837_s14 = sphi %s2951_s14, %s3804_s14   ;;  %s2833_s13 = sphi %s2949_s13, %s3803_s13  }
  0x1d   : > { %3733 = sst [smem:[#allocation30_spill]] %s2849_s17  ;;  %p1658_p0 = scmp.ge.s32.totalorder %s2873_s23, 1 }
  0x1e   : > { %3734 = sst [smem:[#allocation31_spill]] %s2853_s18  ;;  %p3699_p1 = scmp.eq.s32.totalorder %s3005_s24, 0 }
  0x1f   : > { %3735 = sst [smem:[#allocation32_spill]] %s2857_s19  ;;  %p322_p2 = scmp.lt.s32.totalorder %s2873_s23, 5 }
  0x20   : > { %3736 = sst [smem:[#allocation33_spill]] %s2861_s20  ;;  %s2875_s26 = smov [#allocation10]  }
  0x21   : > { %3737 = sst [smem:[#allocation34_spill]] %s2865_s21  ;;  %p3010_p3 = pnand %p1658_p0, %p322_p2 }
  0x22   : > { %3738 = sst [smem:[#allocation35_spill]] %s2869_s22  ;;  %s334_s27 = sshll.u32 %s2875_s26, 4  ;;  %s3014_s27 = int_to_ptr.vmem [resolvable:$true] %s334_s27 }
  0x23   : > { %s3739_s25 = scalar_select %p3010_p3, 1, 0 }
  0x24   : > { %p2259_p4 = pneg %p3010_p3  ;;  %s2876_s29 = smov [#allocation11]  }
  0x25   : > { %3740 = sst [smem:[#allocation36_spill]] %s3739_s25  ;;  %s348_s30 = sshll.u32 %s2876_s29, 4  ;;  %s3024_s30 = int_to_ptr.vmem [resolvable:$true] %s348_s30 }
  0x26   : > { %p3020_p5 = pnand %p2259_p4, %p3699_p1  ;;  %s2877_s11 = smov [#allocation14]  }
  0x27   : > { %s3026_s12 = sshll.u32 %s2877_s11, 4  ;;  %s3742_s4 = sld [smem:[#allocation44_spill]]  ;;  %s370_s12 = int_to_ptr.vmem [resolvable:$true] %s3026_s12 }
  0x28   : > { %s3741_s28 = scalar_select %p3020_p5, 1, 0 }
  0x29   : > { %p3036_p7 = pneg %p3020_p5 }
  0x2d   : > { %s2433_s26 = scalar_lea.hbm %s3742_s4, 6144 }
  0x2e   : > { %p2434_p6 = scmp.ne.s32.totalorder %s3742_s4, %s2433_s26  ;;  %p2440_p10 = scmp.lt.u32.totalorder %s2433_s26, %s3742_s4 }
  0x30   : > { %p2436_p8 = pnand %p3036_p7, %p2434_p6 }
  0x32   : > { %p2437_p9 = pneg %p2436_p8 }
  0x34   : > { %p2442_p11 = pnand %p2440_p10, %p2437_p9 }
  0x36   : > { %2445 = shalt.err (!%p2442_p11)
}
  0x37   : > { %s2446_s10 = scalar_lea.vmem %s3014_s27, 6144  ;;  %p2454_p2 = scmp.lt.s32.totalorder %s3014_s27, %s3014_s27 }
  0x38   : > { %p2447_p12 = scmp.ne.s32.totalorder %s3014_s27, %s2446_s10  ;;  %p2455_p4 = scmp.lt.s32.totalorder %s2446_s10, %s2446_s10 }
  0x3a   : > { %p2449_p13 = pnand %p2447_p12, %p3036_p7  ;;  %p2456_p6 = por %p2455_p4, %p2454_p2 }
  0x3c   : > { %p2450_p0 = pneg %p2449_p13 }
  0x3e   : > { %p2457_p8 = pnand %p2456_p6, %p2450_p0 }
  0x40   : > { %2460 = shalt.err (!%p2457_p8)
}
  0x41   : > { %s3701_s19 = smov 128   ;;  %s3703_s20 = smov 8  }
  0x42   : > { %2262 = dma.hbm_to_vmem [thread:$0]  (!%p3020_p5), %s3742_s4, 6144, %s3014_s27, [#allocation9], %s3701_s19, %s3701_s19, %s3703_s20  }
  0x43   : > { %s3744_s5 = sld [smem:[#allocation45_spill]] }
  0x49   : > { %s2461_s10 = scalar_lea.hbm %s3744_s5, 16 }
  0x4a   : > { %p2462_p9 = scmp.ne.s32.totalorder %s3744_s5, %s2461_s10  ;;  %p2468_p12 = scmp.lt.u32.totalorder %s2461_s10, %s3744_s5 }
  0x4c   : > { %p2464_p10 = pnand %p2462_p9, %p3036_p7 }
  0x4e   : > { %p2465_p11 = pneg %p2464_p10 }
  0x50   : > { %p2470_p13 = pnand %p2468_p12, %p2465_p11 }
  0x52   : > { %2473 = shalt.err (!%p2470_p13)
}
  0x53   : > { %s2474_s27 = scalar_lea.vmem %s3024_s30, 16  ;;  %s2481_s0 = scalar_lea.vmem %s3024_s30, 32 }
  0x54   : > { %p2475_p0 = scmp.ne.s32.totalorder %s3024_s30, %s2474_s27  ;;  %p2482_p6 = scmp.lt.s32.totalorder %s3024_s30, %s3024_s30 }
  0x55   : > { %p2483_p8 = scmp.lt.s32.totalorder %s2481_s0, %s2474_s27 }
  0x56   : > { %p2477_p2 = pnand %p2475_p0, %p3036_p7 }
  0x57   : > { %p2484_p9 = por %p2483_p8, %p2482_p6 }
  0x58   : > { %p2478_p4 = pneg %p2477_p2 }
  0x5a   : > { %p2485_p10 = pnand %p2484_p9, %p2478_p4 }
  0x5c   : > { %2488 = shalt.err (!%p2485_p10)
}
  0x5d   : > { %2265 = dma.hbm_to_vmem [thread:$0]  (!%p3020_p5), %s3744_s5, 16, %s3024_s30, [#allocation12]  }
  0x5e   : > { %s3745_s7 = sld [smem:[#allocation47_spill]] }
  0x64   : > { %s2489_s26 = scalar_lea.hbm %s3745_s7, 6144 }
  0x65   : > { %p2490_p11 = scmp.ne.s32.totalorder %s3745_s7, %s2489_s26  ;;  %p2496_p0 = scmp.lt.u32.totalorder %s2489_s26, %s3745_s7 }
  0x67   : > { %p2492_p12 = pnand %p2490_p11, %p3036_p7 }
  0x69   : > { %p2493_p13 = pneg %p2492_p12 }
  0x6b   : > { %p2498_p2 = pnand %p2496_p0, %p2493_p13 }
  0x6d   : > { %2501 = shalt.err (!%p2498_p2)
}
  0x6e   : > { %s2502_s0 = scalar_lea.vmem %s370_s12, 6144  ;;  %p2510_p9 = scmp.lt.s32.totalorder %s370_s12, %s370_s12 }
  0x6f   : > { %p2503_p4 = scmp.ne.s32.totalorder %s370_s12, %s2502_s0  ;;  %p2511_p10 = scmp.lt.s32.totalorder %s2502_s0, %s2502_s0 }
  0x71   : > { %p2505_p6 = pnand %p2503_p4, %p3036_p7  ;;  %p2512_p1 = por %p2511_p10, %p2510_p9 }
  0x73   : > { %p2506_p8 = pneg %p2505_p6 }
  0x75   : > { %p2513_p3 = pnand %p2512_p1, %p2506_p8 }
  0x77   : > { %2516 = shalt.err (!%p2513_p3)
}
  0x78   : > { %2271 = dma.hbm_to_vmem [thread:$0]  (!%p3020_p5), %s3745_s7, 6144, %s370_s12, [#allocation15], %s3701_s19, %s3701_s19, %s3703_s20  }
  0x79   : > { %s44_s16 = sadd.s32 1, %s2865_s21  ;;  %s47_s17 = sadd.s32 1, %s2869_s22 }
  0x7a   : > { %p45_p1 = scmp.ge.s32.totalorder %s44_s16, 2  ;;  %p3708_p3 = scmp.eq.s32.totalorder %s2873_s23, 0 }
  0x7b   : > { %s86_s25 = sadd.s32 1, %s2841_s15  ;;  %p93_p12 = scmp.ne.s32.totalorder %s2841_s15, %s2837_s14 }
  0x7c   : > { %s3110_s26 = scalar_select %p45_p1, 0, %s44_s16  }
  0x7d   : > { %s3807_s17 = smov (!%p45_p1, %s47_s17), %s2869_s22  ;;  %p99_p13 = scmp.ne.s32.totalorder %s2837_s14, %s2833_s13 }
  0x7e   : > { %3746 = sst [smem:[#allocation37_spill]] %s3110_s26  ;;  %s52_s29 = ssub.s32 %s2865_s21, %s3110_s26 }
  0x7f   : > { %s80_s11 = sadd.s32 1, %s3110_s26  ;;  %p49_p11 = scmp.ge.s32.totalorder %s3807_s17, 2 }
  0x80   : > { %s82_s12 = ssub.s32 %s44_s16, %s80_s11  ;;  %p3124_p0 = por %p93_p12, %p3708_p3 }
  0x81   : > { %s3809_s17 = smov (%p49_p11, %s3807_s17), 0  ;;  %p3749_p2 = scmp.eq.s32.totalorder %s3005_s24, 0 }
  0x82   : > { %3747 = sst [smem:[#allocation38_spill]] %s3809_s17  ;;  %s51_s0 = ssub.s32 %s2869_s22, %s3809_s17 }
  0x83   : > { %p3130_p4 = por %p99_p13, %p3749_p2  ;;  %p3707_p6 = scmp.lt.s32.totalorder %s2873_s23, 4 }
  0x84   : > { %s3137_s30 = sor.u32 %s52_s29, %s51_s0  ;;  %s83_s13 = sor.u32 %s82_s12, %s51_s0 }
  0x85   : > { %s3750_s27 = scalar_select %p3130_p4, 1, 0 }
  0x86   : > { %p84_p9 = scmp.eq.s32.totalorder %s83_s13, 0  ;;  %s1667_s2 = sshll.u32 %s2865_s21, 1 }
  0x87   : > { %s2223_s16 = smul.u32 6, %s2869_s22  ;;  %s3712_s20 = sand.u32 1, %s2873_s23  }
  0x88   : > { %s3143_s11 = scalar_select %p84_p9, %s2841_s15, %s86_s25  }
  0x89   : > { %s415_s19 = sadd.s32 %s2223_s16, %s1667_s2  ;;  %s430_s5 = sand.u32 1, %s2841_s15  }
  0x8a   : > { %s3146_s4 = sshll.u32 %s415_s19, 7  ;;  %s3751_s1 = sld [smem:[#allocation41_spill]] }
  0x8b   : > { %s3153_s26 = sshll.u32 %s430_s5, 4  ;;  %p3161_p10 = pnand %p3707_p6, %p3124_p0 }
  0x8c   : > { %s432_s19 = scalar_lea.vmem [#allocation5], %s3153_s26  ;;  %s3170_s5 = scalar_lea.sflag [#allocation6], %s3712_s20 }
  0x8d   : > { %s3752_s25 = scalar_select %p3161_p10, 1, 0 }
  0x8e   : > { %s442_s0 = sshll.u32 %s432_s19, 4  ;;  %p3715_p11 = pneg %p3161_p10  ;;  %s3166_s0 = int_to_ptr.vmem [resolvable:$true] %s442_s0 }
  0x90   : > { %s1483_s29 = scalar_lea.hbm %s3751_s1, %s3146_s4  ;;  %s2522_s13 = scalar_lea.hbm %s3751_s1, 1536 }
  0x91   : > { %s3155_s12 = scalar_lea.hbm %s1483_s29, 256  ;;  %s2547_s7 = scalar_lea.hbm %s1483_s29, 512 }
  0x92   : > { %p2518_p1 = scmp.ne.s32.totalorder %s3155_s12, %s2547_s7  ;;  %p2523_p0 = scmp.lt.u32.totalorder %s3155_s12, %s3751_s1 }
  0x93   : > { %p2524_p2 = scmp.lt.u32.totalorder %s2522_s13, %s2547_s7  ;;  %p2526_p6 = scmp.lt.u32.totalorder %s2547_s7, %s3155_s12 }
  0x94   : > { %p2520_p12 = pnand %p3715_p11, %p2518_p1 }
  0x95   : > { %p2525_p9 = por %p2524_p2, %p2523_p0 }
  0x96   : > { %p2521_p13 = pneg %p2520_p12 }
  0x97   : > { %p2527_p3 = por %p2526_p6, %p2525_p9 }
  0x99   : > { %p2528_p8 = pnand %p2527_p3, %p2521_p13 }
  0x9b   : > { %2531 = shalt.err (!%p2528_p8)
}
  0x9c   : > { %s2532_s29 = scalar_lea.vmem %s3166_s0, 256  ;;  %s2880_s19 = smov [#allocation5]  }
  0x9d   : > { %p2533_p1 = scmp.ne.s32.totalorder %s3166_s0, %s2532_s29  ;;  %s2537_s17 = sshll.u32 %s2880_s19, 4  ;;  %s2538_s17 = int_to_ptr.vmem [resolvable:$false] %s2537_s17 }
  0x9e   : > { %s2539_s10 = scalar_lea.vmem %s2538_s17, 512  ;;  %p2540_p5 = scmp.lt.s32.totalorder %s3166_s0, %s2538_s17 }
  0x9f   : > { %p2535_p12 = pnand %p2533_p1, %p3715_p11  ;;  %p2541_p0 = scmp.lt.s32.totalorder %s2539_s10, %s2532_s29 }
  0xa1   : > { %p2536_p4 = pneg %p2535_p12  ;;  %p2542_p2 = por %p2541_p0, %p2540_p5 }
  0xa3   : > { %p2543_p6 = pnand %p2542_p2, %p2536_p4 }
  0xa5   : > { %2546 = shalt.err (!%p2543_p6)
}
  0xa6   : > { %s3753_s7 = smov 8   ;;  %s3754_s13 = smov 128  }
  0xa7   : > { %2284 = dma.hbm_to_vmem [thread:$0]  (!%p3161_p10), %s3155_s12, 256, %s3166_s0, %s3170_s5, %s3754_s13, %s3754_s13, %s3753_s7  }
  0xa8   : > { %s479_s2 = scalar_lea.vmem [#allocation8], %s3153_s26  ;;  %s2881_s19 = smov [#allocation13]  }
  0xa9   : > { %s489_s16 = sshll.u32 %s479_s2, 4  ;;  %s359_s20 = sshll.u32 %s2881_s19, 4  ;;  %s3201_s16 = int_to_ptr.vmem [resolvable:$true] %s489_s16  ;;  %s360_s20 = int_to_ptr.vmem [resolvable:$true] %s359_s20 }
  0xaa   : > { %s3755_s6 = sld [smem:[#allocation46_spill]] }
  0xb0   : > { %s2548_s10 = scalar_lea.hbm %s3755_s6, 16 }
  0xb1   : > { %p2549_p5 = scmp.ne.s32.totalorder %s3755_s6, %s2548_s10  ;;  %p2555_p8 = scmp.lt.u32.totalorder %s2548_s10, %s3755_s6 }
  0xb3   : > { %p2551_p3 = pnand %p2549_p5, %p3036_p7 }
  0xb5   : > { %p2552_p4 = pneg %p2551_p3 }
  0xb7   : > { %p2557_p13 = pnand %p2555_p8, %p2552_p4 }
  0xb9   : > { %2560 = shalt.err (!%p2557_p13)
}
  0xba   : > { %s2561_s26 = scalar_lea.vmem %s360_s20, 16  ;;  %s2568_s0 = scalar_lea.vmem %s360_s20, 32 }
  0xbb   : > { %p2562_p9 = scmp.ne.s32.totalorder %s360_s20, %s2561_s26  ;;  %p2569_p0 = scmp.lt.s32.totalorder %s360_s20, %s360_s20 }
  0xbc   : > { %p2570_p2 = scmp.lt.s32.totalorder %s2568_s0, %s2561_s26 }
  0xbd   : > { %p2564_p1 = pnand %p2562_p9, %p3036_p7 }
  0xbe   : > { %p2571_p6 = por %p2570_p2, %p2569_p0 }
  0xbf   : > { %p2565_p12 = pneg %p2564_p1 }
  0xc1   : > { %p2572_p11 = pnand %p2571_p6, %p2565_p12 }
  0xc3   : > { %2575 = shalt.err (!%p2572_p11)
}
  0xc4   : > { %p3756_p5 = scmp.ne.s32.totalorder %s3741_s28, 0  ;;  %s2882_s21 = smov [#allocation16]  }
  0xc5   : > { %s383_s2 = sshll.u32 %s2882_s21, 4  ;;  %s2883_s19 = smov [#allocation17]   ;;  %s384_s2 = int_to_ptr.vmem [resolvable:$true] %s383_s2 }
  0xc6   : > { %2268 = dma.hbm_to_vmem [thread:$0]  (!%p3756_p5), %s3755_s6, 16, %s360_s20, [#allocation12]  }
  0xc7   : > { %s394_s29 = sshll.u32 %s2883_s19, 4  ;;  %s3757_s8 = sld [smem:[#allocation48_spill]]  ;;  %s3221_s29 = int_to_ptr.vmem [resolvable:$true] %s394_s29 }
  0xcd   : > { %s2576_s12 = scalar_lea.hbm %s3757_s8, 16 }
  0xce   : > { %p2577_p11 = scmp.ne.s32.totalorder %s3757_s8, %s2576_s12  ;;  %p2583_p8 = scmp.lt.u32.totalorder %s2576_s12, %s3757_s8 }
  0xd0   : > { %p2579_p3 = pnand %p2577_p11, %p3036_p7 }
  0xd2   : > { %p2580_p4 = pneg %p2579_p3 }
  0xd4   : > { %p2585_p13 = pnand %p2583_p8, %p2580_p4 }
  0xd6   : > { %2588 = shalt.err (!%p2585_p13)
}
  0xd7   : > { %s2589_s22 = scalar_lea.vmem %s384_s2, 16  ;;  %s2596_s21 = scalar_lea.vmem %s384_s2, 32 }
  0xd8   : > { %p2590_p9 = scmp.ne.s32.totalorder %s384_s2, %s2589_s22  ;;  %p2597_p0 = scmp.lt.s32.totalorder %s384_s2, %s384_s2 }
  0xd9   : > { %p2598_p2 = scmp.lt.s32.totalorder %s2596_s21, %s2589_s22 }
  0xda   : > { %p2592_p1 = pnand %p2590_p9, %p3036_p7 }
  0xdb   : > { %p2599_p6 = por %p2598_p2, %p2597_p0 }
  0xdc   : > { %p2593_p12 = pneg %p2592_p1 }
  0xde   : > { %p2600_p10 = pnand %p2599_p6, %p2593_p12 }
  0xe0   : > { %2603 = shalt.err (!%p2600_p10)
}
  0xe1   : > { %2274 = dma.hbm_to_vmem [thread:$0]  (!%p3756_p5), %s3757_s8, 16, %s384_s2, [#allocation15]  }
  0xe2   : > { %s3758_s9 = sld [smem:[#allocation49_spill]] }
  0xe8   : > { %s2604_s26 = scalar_lea.hbm %s3758_s9, 16 }
  0xe9   : > { %p2605_p11 = scmp.ne.s32.totalorder %s3758_s9, %s2604_s26  ;;  %p2611_p10 = scmp.lt.u32.totalorder %s2604_s26, %s3758_s9 }
  0xeb   : > { %p2607_p3 = pnand %p2605_p11, %p3036_p7 }
  0xed   : > { %p2608_p4 = pneg %p2607_p3 }
  0xef   : > { %p2613_p8 = pnand %p2611_p10, %p2608_p4 }
  0xf1   : > { %2616 = shalt.err (!%p2613_p8)
}
  0xf2   : > { %s2617_s2 = scalar_lea.vmem %s3221_s29, 16  ;;  %s2624_s21 = scalar_lea.vmem %s3221_s29, 32 }
  0xf3   : > { %p2618_p13 = scmp.ne.s32.totalorder %s3221_s29, %s2617_s2  ;;  %p2625_p12 = scmp.lt.s32.totalorder %s3221_s29, %s3221_s29 }
  0xf4   : > { %p2626_p0 = scmp.lt.s32.totalorder %s2624_s21, %s2617_s2 }
  0xf5   : > { %p2620_p9 = pnand %p2618_p13, %p3036_p7 }
  0xf6   : > { %p2627_p2 = por %p2626_p0, %p2625_p12 }
  0xf7   : > { %p2621_p1 = pneg %p2620_p9 }
  0xf9   : > { %p2628_p6 = pnand %p2627_p2, %p2621_p1 }
  0xfb   : > { %2631 = shalt.err (!%p2628_p6)
}
  0xfc   : > { %s3759_s3 = sld [smem:[#allocation30_spill]]  ;;  %s3760_s10 = sld [smem:[#allocation29_spill]] }
  0xfd   : > { %2277 = dma.hbm_to_vmem [thread:$0]  (!%p3756_p5), %s3758_s9, 16, %s3221_s29, [#allocation18]  }
  0xfe   : > { %s1657_s28 = sadd.s32 4294967294, %s2873_s23   ;;  %s56_s12 = sadd.s32 1, %s2853_s18 }
  0xff   : > { %p3761_p7 = scmp.eq.s32.totalorder %s3137_s30, 0  ;;  %p309_p4 = scmp.eq.s32.totalorder %s3005_s24, 3 }
 0x100   : > { %p315_p10 = scmp.eq.s32.totalorder %s1657_s28, 3  ;;  %p3763_p8 = scmp.eq.s32.totalorder %s2873_s23, 0 }
 0x101   : > { %s3270_s26 = scalar_select %p3761_p7, %s2853_s18, %s56_s12  }
 0x102   : > { %p63_p11 = scmp.ne.s32.totalorder %s2853_s18, %s3759_s3  ;;  %p69_p3 = scmp.ne.s32.totalorder %s3759_s3, %s3760_s10 }
 0x103   : > { %3762 = sst [smem:[#allocation39_spill]] %s3270_s26  ;;  %p3764_p9 = scmp.eq.s32.totalorder %s3005_s24, 0 }
 0x104   : > { %p65_p13 = por %p3763_p8, %p63_p11  ;;  %p3285_p12 = por %p309_p4, %p63_p11 }
 0x105   : > { %p3281_p1 = por %p3764_p9, %p69_p3  ;;  %p3289_p5 = por %p315_p10, %p69_p3 }
 0x106   : > { %s3766_s1 = scalar_select %p3285_p12, 1, 0 }
 0x107   : > { %s3767_s29 = scalar_select %p3289_p5, 1, 0 }
 0x108   : > { %s405_s30 = sand.u32 1, %s2853_s18   ;;  %s3768_s2 = sld [smem:[#allocation40_spill]] }
 0x109   : > { %s3300_s19 = sshll.u32 %s405_s30, 4  ;;  %p3769_p0 = scmp.lt.s32.totalorder %s2873_s23, 4 }
 0x10a   : > { %s409_s3 = scalar_lea.vmem [#allocation2], %s3300_s19  ;;  %s3311_s28 = scalar_lea.sflag [#allocation3], %s405_s30 }
 0x10b   : > { %p3304_p2 = pnand %p3769_p0, %p65_p13  ;;  %s418_s10 = sshll.u32 %s409_s3, 4  ;;  %s3309_s10 = int_to_ptr.vmem [resolvable:$true] %s418_s10 }
 0x10d   : > { %p2634_p7 = pneg %p3304_p2 }
 0x10e   : > { %s3298_s21 = scalar_lea.hbm %s3768_s2, %s3146_s4  ;;  %s2637_s6 = scalar_lea.hbm %s3768_s2, 1536 }
 0x10f   : > { %s2632_s12 = scalar_lea.hbm %s3298_s21, 256  ;;  %p2638_p4 = scmp.lt.u32.totalorder %s3298_s21, %s3768_s2 }
 0x110   : > { %p2633_p6 = scmp.ne.s32.totalorder %s3298_s21, %s2632_s12  ;;  %p2639_p10 = scmp.lt.u32.totalorder %s2637_s6, %s2632_s12 }
 0x111   : > { %p2641_p13 = scmp.lt.u32.totalorder %s2632_s12, %s3298_s21 }
 0x112   : > { %p2635_p11 = pnand %p2634_p7, %p2633_p6  ;;  %p2640_p8 = por %p2639_p10, %p2638_p4 }
 0x114   : > { %p2636_p3 = pneg %p2635_p11  ;;  %p2642_p9 = por %p2641_p13, %p2640_p8 }
 0x116   : > { %p2643_p0 = pnand %p2642_p9, %p2636_p3 }
 0x118   : > { %2646 = shalt.err (!%p2643_p0)
}
 0x119   : > { %s2647_s30 = scalar_lea.vmem %s3309_s10, 256  ;;  %s2884_s3 = smov [#allocation2]  }
 0x11a   : > { %p2648_p6 = scmp.ne.s32.totalorder %s3309_s10, %s2647_s30  ;;  %s2652_s20 = sshll.u32 %s2884_s3, 4  ;;  %s2653_s20 = int_to_ptr.vmem [resolvable:$false] %s2652_s20 }
 0x11b   : > { %s2654_s8 = scalar_lea.vmem %s2653_s20, 512  ;;  %p2655_p12 = scmp.lt.s32.totalorder %s3309_s10, %s2653_s20 }
 0x11c   : > { %p2650_p11 = pnand %p2648_p6, %p2634_p7  ;;  %p2656_p4 = scmp.lt.s32.totalorder %s2654_s8, %s2647_s30 }
 0x11e   : > { %p2651_p5 = pneg %p2650_p11  ;;  %p2657_p10 = por %p2656_p4, %p2655_p12 }
 0x120   : > { %p2658_p8 = pnand %p2657_p10, %p2651_p5 }
 0x122   : > { %2661 = shalt.err (!%p2658_p8)
}
 0x123   : > { %2281 = dma.hbm_to_vmem [thread:$0]  (!%p3304_p2), %s3298_s21, 256, %s3309_s10, %s3311_s28, %s3754_s13, %s3754_s13, %s3753_s7  }
 0x124   : > { %s456_s6 = scalar_lea.vmem [#allocation7], %s3300_s19  ;;  %s3771_s30 = sld [smem:[#allocation42_spill]] }
 0x125   : > { %s465_s9 = sshll.u32 %s456_s6, 4  ;;  %s3772_s2 = sld [smem:[#allocation43_spill]]  ;;  %s3349_s9 = int_to_ptr.vmem [resolvable:$true] %s465_s9 }
 0x12a   : > { %s3347_s3 = scalar_lea.hbm %s3771_s30, %s3146_s4  ;;  %s2667_s10 = scalar_lea.hbm %s3771_s30, 1536 }
 0x12b   : > { %s3355_s26 = scalar_lea.hbm %s3772_s2, %s3146_s4  ;;  %s2662_s18 = scalar_lea.hbm %s3347_s3, 256 }
 0x12c   : > { %p2663_p12 = scmp.ne.s32.totalorder %s3347_s3, %s2662_s18  ;;  %p2668_p13 = scmp.lt.u32.totalorder %s3347_s3, %s3771_s30 }
 0x12d   : > { %p2669_p9 = scmp.lt.u32.totalorder %s2667_s10, %s2662_s18  ;;  %p2671_p6 = scmp.lt.u32.totalorder %s2662_s18, %s3347_s3 }
 0x12e   : > { %p2665_p5 = pnand %p2663_p12, %p2634_p7 }
 0x12f   : > { %p2670_p0 = por %p2669_p9, %p2668_p13 }
 0x130   : > { %p2666_p3 = pneg %p2665_p5 }
 0x131   : > { %p2672_p11 = por %p2671_p6, %p2670_p0 }
 0x133   : > { %p2673_p4 = pnand %p2672_p11, %p2666_p3 }
 0x135   : > { %2676 = shalt.err (!%p2673_p4)
}
 0x136   : > { %s2677_s4 = scalar_lea.vmem %s3349_s9, 256  ;;  %s2885_s12 = smov [#allocation7]  }
 0x137   : > { %p2678_p10 = scmp.ne.s32.totalorder %s3349_s9, %s2677_s4  ;;  %s2682_s22 = sshll.u32 %s2885_s12, 4  ;;  %s2683_s22 = int_to_ptr.vmem [resolvable:$false] %s2682_s22 }
 0x138   : > { %s2684_s20 = scalar_lea.vmem %s2683_s22, 512  ;;  %p2685_p5 = scmp.lt.s32.totalorder %s3349_s9, %s2683_s22 }
 0x139   : > { %p2680_p8 = pnand %p2678_p10, %p2634_p7  ;;  %p2686_p13 = scmp.lt.s32.totalorder %s2684_s20, %s2677_s4 }
 0x13b   : > { %p2681_p12 = pneg %p2680_p8  ;;  %p2687_p9 = por %p2686_p13, %p2685_p5 }
 0x13d   : > { %p2688_p0 = pnand %p2687_p9, %p2681_p12 }
 0x13f   : > { %2691 = shalt.err (!%p2688_p0)
}
 0x140   : > { %2287 = dma.hbm_to_vmem [thread:$0]  (!%p3304_p2), %s3347_s3, 256, %s3349_s9, %s3170_s5, %s3754_s13, %s3754_s13, %s3753_s7  }
 0x141   : > { %s3385_s18 = scalar_lea.hbm %s3355_s26, 256  ;;  %s3773_s8 = sand.u32 1, %s2873_s23  }
 0x142   : > { %s3389_s21 = scalar_lea.sflag [#allocation9], %s3773_s8  ;;  %s2722_s17 = scalar_lea.hbm %s3355_s26, 512 }
 0x143   : > { %p2693_p7 = scmp.ne.s32.totalorder %s3385_s18, %s2722_s17  ;;  %p3774_p3 = scmp.ne.s32.totalorder %s3752_s25, 0 }
 0x144   : > { %s2697_s28 = scalar_lea.hbm %s3772_s2, 1536  ;;  %p2698_p2 = scmp.lt.u32.totalorder %s3385_s18, %s3772_s2 }
 0x145   : > { %p3775_p6 = pneg %p3774_p3  ;;  %p2699_p10 = scmp.lt.u32.totalorder %s2697_s28, %s2722_s17 }
 0x146   : > { %p2701_p12 = scmp.lt.u32.totalorder %s2722_s17, %s3385_s18 }
 0x147   : > { %p2695_p11 = pnand %p2693_p7, %p3775_p6  ;;  %p2700_p8 = por %p2699_p10, %p2698_p2 }
 0x149   : > { %p2696_p4 = pneg %p2695_p11  ;;  %p2702_p5 = por %p2701_p12, %p2700_p8 }
 0x14b   : > { %p2703_p13 = pnand %p2702_p5, %p2696_p4 }
 0x14d   : > { %2706 = shalt.err (!%p2703_p13)
}
 0x14e   : > { %s2707_s26 = scalar_lea.vmem %s3201_s16, 256  ;;  %p3776_p0 = pmov %p3775_p6 }
 0x14f   : > { %p2708_p9 = scmp.ne.s32.totalorder %s3201_s16, %s2707_s26  ;;  %s2886_s9 = smov [#allocation8]  }
 0x150   : > { %s2712_s3 = sshll.u32 %s2886_s9, 4  ;;  %s2713_s3 = int_to_ptr.vmem [resolvable:$false] %s2712_s3 }
 0x151   : > { %p2710_p7 = pnand %p2708_p9, %p3776_p0  ;;  %s2714_s4 = scalar_lea.vmem %s2713_s3, 512 }
 0x152   : > { %p2715_p11 = scmp.lt.s32.totalorder %s3201_s16, %s2713_s3  ;;  %p2716_p2 = scmp.lt.s32.totalorder %s2714_s4, %s2707_s26 }
 0x153   : > { %p2711_p6 = pneg %p2710_p7 }
 0x154   : > { %p2717_p10 = por %p2716_p2, %p2715_p11 }
 0x156   : > { %p2718_p8 = pnand %p2717_p10, %p2711_p6 }
 0x158   : > { %2721 = shalt.err (!%p2718_p8)
}
 0x159   : > { %2290 = dma.hbm_to_vmem [thread:$0]  (!%p3774_p3), %s3385_s18, 256, %s3201_s16, %s3389_s21, %s3754_s13, %s3754_s13, %s3753_s7  }
 0x15a   : > { %s3777_s12 = sld [smem:[#allocation36_spill]] }
 0x160   : > { %p3778_p4 = scmp.ne.s32.totalorder %s3777_s12, 0 }
 0x161   : > { %s3779_s22 = sld [smem:[#allocation30_spill]] (!%p3778_p4) }
 0x162   : > { %501 = sbr.rel (%p3778_p4) target bundleno = 1781 (0x6f5), region = 60 }
 0x167   : > { %s3421_s20 = sand.u32 (!%p3778_p4), 1, %s3779_s22  }
 0x168   : > { %s3424_s8 = sshll.u32 (!%p3778_p4), %s3421_s20, 4  ;;  %s504_s25 = scalar_lea.sflag (!%p3778_p4), [#allocation3], %s3421_s20 }
 0x169   : > { %s507_s17 = scalar_lea.vmem [#allocation2], %s3424_s8 }
 0x16a   : > { %2796 = dma.done.wait (%p3281_p1), %s504_s25, 256  }
 0x16b   : > { %2798 = vsyncadd (%p3281_p1), %s504_s25, 4294967040  ;;  %s512_s7 = sand.u32 1, %s3005_s24   ;;  %s514_s13 = sand.u32 1, %s2837_s14  }
 0x16c   : > { %s3434_s16 = sshll.u32 %s514_s13, 4  ;;  %s513_s18 = scalar_lea.sflag [#allocation6], %s512_s7 }
 0x16d   : > { %s516_s21 = scalar_lea.vmem [#allocation5], %s3434_s16  ;;  %p3780_p3 = scmp.ne.s32.totalorder %s3750_s27, 0 }
 0x16f   : > { %2800 = dma.done.wait (%p3780_p3), %s513_s18, 256  }
 0x170   : > { %2802 = vsyncadd (%p3780_p3), %s513_s18, 4294967040  ;;  %s525_s19 = scalar_lea.vmem [#allocation7], %s3424_s8 }
 0x171   : > { %2804 = dma.done.wait (%p3281_p1), %s513_s18, 256  }
 0x172   : > { %2806 = vsyncadd (%p3281_p1), %s513_s18, 4294967040  ;;  %s531_s10 = scalar_lea.sflag [#allocation9], %s512_s7  ;;  %s534_s28 = scalar_lea.vmem [#allocation8], %s3434_s16 }
 0x173   : > { %2808 = dma.done.wait (%p3780_p3), %s531_s10, 256  }
 0x174   : > { %2810 = vsyncadd (%p3780_p3), %s531_s10, 4294967040  ;;  %p3781_p12 = scmp.eq.s32.totalorder %s3005_s24, 0 }
 0x176   : > { %2812 = dma.done.wait (%p3781_p12), [#allocation9], 6144   ;;  %p3782_p5 = pmov %p3781_p12 }
 0x178   : > { %2814 = vsyncadd (%p3782_p5), [#allocation9], 4294961152  ;;  %p3783_p13 = pmov %p3782_p5 }
 0x179   : > { %p3784_p1 = pmov %p3782_p5 }
 0x17a   : > { %2816 = dma.done.wait (%p3783_p13), [#allocation12], 32  }
 0x17b   : > { %2818 = vsyncadd (%p3784_p1), [#allocation12], 4294967264  ;;  %p3785_p9 = pmov %p3784_p1 }
 0x17c   : > { %p3786_p0 = pmov %p3784_p1 }
 0x17d   : > { %2820 = dma.done.wait (%p3785_p9), [#allocation15], 6160  }
 0x17e   : > { %2822 = vsyncadd (%p3786_p0), [#allocation15], 4294961136  ;;  %p3787_p7 = pmov %p3786_p0 }
 0x17f   : > { %p3788_p6 = pmov %p3786_p0 }
 0x180   : > { %2824 = dma.done.wait (%p3787_p7), [#allocation18], 16  }
 0x181   : > { %2826 = vsyncadd (%p3788_p6), [#allocation18], 4294967280  ;;  %v2887_v0 = vmov 0   ;;  %v2888_v1 = vmov 0.0|0.0   ;;  %v620_v2 = vld [vmem:[%s525_s19] sm:$0xff]  ;;  %v659_v5 = vld [vmem:[#allocation10 + $0x88] sm:$0xff] }
 0x182   : > { %2411 = vset.pattern.permute.xlu0 %v2887_v0  ;;  %2412 = vset.pattern.permute.xlu1 %v2887_v0  ;;  %v622_v3 = vld [vmem:[%s534_s28] sm:$0xff]  ;;  %v621_v7 = vld [vmem:[%s525_s19 + $0x8] sm:$0xff]  ;;  %vm2889_vm0 = vmmov 0   ;;  %v2890_v14 = vmov 0.0   ;;  %vm863_vm1 = vcmask 1045504   ;;  %vm677_vm2 = vcmask 1046528  }
 0x183   : > { %2039 = vmatprep.subr.bf16.mxu0 %v2888_v1  ;;  %625 = vperm.xlu0 %2411, %v620_v2   ;;  %v658_v4 = vld [vmem:[#allocation10 + $0x80] sm:$0xff]  ;;  %v660_v6 = vld [vmem:[#allocation10 + $0x90] sm:$0xff]  ;;  %v661_v9 = vld [vmem:[#allocation10 + $0x98] sm:$0xff]  ;;  %vm961_vm3 = vcmask 1041408   ;;  %s3789_s24 = sld [smem:[#allocation32_spill]]  ;;  %s3790_s27 = sld [smem:[#allocation33_spill]] }
 0x184   : > { %635 = vperm.xlu1 %2412, %v622_v3   ;;  %v2040_v8 = vpack.c.bf16 %v659_v5, %v658_v4  ;;  %v2043_v10 = vpack.c.bf16 %v661_v9, %v660_v6  ;;  %v662_v11 = vld [vmem:[#allocation10 + $0xa0] sm:$0xff]  ;;  %v663_v12 = vld [vmem:[#allocation10 + $0xa8] sm:$0xff]  ;;  %1843 = vmatprep.mubr.msk.f32.mxu0 %vm2889_vm0, %v2890_v14  ;;  %v664_v15 = vld [vmem:[#allocation10 + $0xb0] sm:$0xff]  ;;  %s609_s9 = scalar_lea.vmem [#allocation19], %s3424_s8  ;;  %s3791_s22 = sld [smem:[#allocation50_spill]] }
 0x185   : > { %v2046_v13 = vpack.c.bf16 %v663_v12, %v662_v11  ;;  %v665_v16 = vld [vmem:[#allocation10 + $0xb8] sm:$0xff]  ;;  %v666_v18 = vld [vmem:[#allocation10 + $0xc0] sm:$0xff]  ;;  %v667_v19 = vld [vmem:[#allocation10 + $0xc8] sm:$0xff]  ;;  %s1432_s3 = sshll.u32 %s609_s9, 4  ;;  %s1417_s8 = scalar_lea.sflag [#allocation4], %s3421_s20  ;;  %s3619_s3 = int_to_ptr.vmem [resolvable:$true] %s1432_s3 }
 0x186   : > { %2041 = vmatpush3.bf16.msra.mxu0 %v2040_v8  ;;  %v2049_v17 = vpack.c.bf16 %v665_v16, %v664_v15  ;;  %v2052_v20 = vpack.c.bf16 %v667_v19, %v666_v18  ;;  %v668_v21 = vld [vmem:[#allocation10 + $0xd0] sm:$0xff]  ;;  %v669_v22 = vld [vmem:[#allocation10 + $0xd8] sm:$0xff]  ;;  %v670_v24 = vld [vmem:[#allocation10 + $0xe0] sm:$0xff]  ;;  %s2723_s7 = scalar_lea.vmem %s3619_s3, 256  ;;  %p3793_p2 = scmp.ne.s32.totalorder %s3766_s1, 0 }
 0x187   : > { %630 = vperm.xlu0 %2411, %v621_v7   ;;  %2042 = vmatprep.subr.bf16.mxu0 %v2888_v1  ;;  %v2055_v23 = vpack.c.bf16 %v669_v22, %v668_v21  ;;  %v671_v25 = vld [vmem:[#allocation10 + $0xe8] sm:$0xff]  ;;  %v672_v27 = vld [vmem:[#allocation10 + $0xf0] sm:$0xff]  ;;  %v673_v28 = vld [vmem:[#allocation10 + $0xf8] sm:$0xff]  ;;  %p2724_p11 = scmp.ne.s32.totalorder %s3619_s3, %s2723_s7  ;;  %s2891_s13 = smov [#allocation19]  }
 0x188   : > { %v2058_v26 = vpack.c.bf16 %v671_v25, %v670_v24  ;;  %v2061_v29 = vpack.c.bf16 %v673_v28, %v672_v27  ;;  %v3480_v30 = vld [vmem:[%s516_s21] sm:$0xff]  ;;  %v3496_v35 = vld [vmem:[%s507_s17 + $0x8] sm:$0xff]  ;;  %s2727_s16 = sshll.u32 %s2891_s13, 4  ;;  %s2728_s16 = int_to_ptr.vmem [resolvable:$false] %s2727_s16 }
 0x189   : > { %v3486_v32 = vld [vmem:[%s507_s17] sm:$0xff]  ;;  %v642_v38 = vld [vmem:[#allocation10 + $0x8] sm:$0xff]  ;;  %v644_v48 = vld [vmem:[#allocation10 + $0x18] sm:$0xff]  ;;  %s1695_s0 = sshll.u32 %s3789_s24, 1  ;;  %s1696_s6 = sshll.u32 %s3790_s27, 2 }
 0x18a   : > { %2044 = vmatpush3.bf16.msra.mxu0 %v2043_v10  ;;  %v641_v37 = vld [vmem:[#allocation10] sm:$0xff]  ;;  %v643_v47 = vld [vmem:[#allocation10 + $0x10] sm:$0xff]  ;;  %v646_v55 = vld [vmem:[#allocation10 + $0x28] sm:$0xff]  ;;  %s1429_s5 = sadd.s32 %s1696_s6, %s1695_s0  ;;  %s3792_s25 = smov %s3791_s22 }
 0x18b   : > { %2045 = vmatprep.subr.bf16.mxu0 %v2888_v1  ;;  %v2064_v42 = vpack.c.bf16 %v642_v38, %v641_v37  ;;  %v2067_v53 = vpack.c.bf16 %v644_v48, %v643_v47  ;;  %v645_v54 = vld [vmem:[#allocation10 + $0x20] sm:$0xff]  ;;  %v647_v58 = vld [vmem:[#allocation10 + $0x30] sm:$0xff]  ;;  %v648_v59 = vld [vmem:[#allocation10 + $0x38] sm:$0xff]  ;;  %s1697_s26 = sshll.u32 %s1429_s5, 7  ;;  %p2725_p10 = pnand %p2724_p11, %p3793_p2 }
 0x18c   : > { %v2070_v57 = vpack.c.bf16 %v646_v55, %v645_v54  ;;  %v2073_v60 = vpack.c.bf16 %v648_v59, %v647_v58  ;;  %v649_v61 = vld [vmem:[#allocation10 + $0x40] sm:$0xff]  ;;  %v650_v62 = vld [vmem:[#allocation10 + $0x48] sm:$0xff]  ;;  %v651_v0 = vld [vmem:[#allocation10 + $0x50] sm:$0xff]  ;;  %s3617_s17 = scalar_lea.hbm %s3791_s22, %s1697_s26  ;;  %s2729_s18 = scalar_lea.vmem %s2728_s16, 512 }
 0x18d   : > { %v2076_v63 = vpack.c.bf16 %v650_v62, %v649_v61  ;;  %v652_v2 = vld [vmem:[#allocation10 + $0x58] sm:$0xff]  ;;  %v653_v4 = vld [vmem:[#allocation10 + $0x60] sm:$0xff]  ;;  %v654_v5 = vld [vmem:[#allocation10 + $0x68] sm:$0xff]  ;;  %p2726_p8 = pneg %p2725_p10  ;;  %p2730_p4 = scmp.lt.s32.totalorder %s3619_s3, %s2728_s16 }
 0x18e   : > { %2047 = vmatpush3.bf16.msra.mxu0 %v2046_v13  ;;  %v2079_v3 = vpack.c.bf16 %v652_v2, %v651_v0  ;;  %v2082_v6 = vpack.c.bf16 %v654_v5, %v653_v4  ;;  %v655_v7 = vld [vmem:[#allocation10 + $0x70] sm:$0xff]  ;;  %v656_v8 = vld [vmem:[#allocation10 + $0x78] sm:$0xff]  ;;  %v847_v10 = vld [vmem:[#allocation10 + $0x100] sm:$0xff]  ;;  %p2731_p3 = scmp.lt.s32.totalorder %s2729_s18, %s2723_s7 }
 0x18f   : > { %2048 = vmatprep.subr.bf16.mxu0 %v2888_v1  ;;  %v2085_v9 = vpack.c.bf16 %v656_v8, %v655_v7  ;;  %v848_v11 = vld [vmem:[#allocation10 + $0x108] sm:$0xff]  ;;  %v849_v13 = vld [vmem:[#allocation10 + $0x110] sm:$0xff]  ;;  %v850_v15 = vld [vmem:[#allocation10 + $0x118] sm:$0xff] }
 0x190   : > { %v2088_v12 = vpack.c.bf16 %v848_v11, %v847_v10  ;;  %v2091_v16 = vpack.c.bf16 %v850_v15, %v849_v13  ;;  %v852_v18 = vld [vmem:[#allocation10 + $0x128] sm:$0xff]  ;;  %v854_v21 = vld [vmem:[#allocation10 + $0x138] sm:$0xff]  ;;  %v861_v38 = vld [vmem:[#allocation10 + $0x170] sm:$0xff]  ;;  %p2732_p12 = por %p2731_p3, %p2730_p4 }
 0x191   : > { %v856_v24 = vld [vmem:[#allocation10 + $0x148] sm:$0xff]  ;;  %v858_v27 = vld [vmem:[#allocation10 + $0x158] sm:$0xff] }
 0x192   : > { %2050 = vmatpush3.bf16.msra.mxu0 %v2049_v17  ;;  %v851_v17 = vld [vmem:[#allocation10 + $0x120] sm:$0xff]  ;;  %v1069_v62 = vld [vmem:[#allocation14 + $0x90] sm:$0xff]  ;;  %p2733_p5 = pnand %p2732_p12, %p2726_p8 }
 0x193   : > { %2051 = vmatprep.subr.bf16.mxu0 %v2888_v1  ;;  %v2094_v19 = vpack.c.bf16 %v852_v18, %v851_v17  ;;  %v1067_v59 = vld [vmem:[#allocation14 + $0x80] sm:$0xff]  ;;  %v1073_v5 = vld [vmem:[#allocation14 + $0xb0] sm:$0xff] }
 0x194   : > { %v1071_v0 = vld [vmem:[#allocation14 + $0xa0] sm:$0xff]  ;;  %v1077_v11 = vld [vmem:[#allocation14 + $0xd0] sm:$0xff] }
 0x195   : > { %v1075_v8 = vld [vmem:[#allocation14 + $0xc0] sm:$0xff]  ;;  %v1081_v18 = vld [vmem:[#allocation14 + $0xf0] sm:$0xff] }
 0x196   : > { %2053 = vmatpush3.bf16.msra.mxu0 %v2052_v20  ;;  %v853_v20 = vld [vmem:[#allocation10 + $0x130] sm:$0xff]  ;;  %v1079_v15 = vld [vmem:[#allocation14 + $0xe0] sm:$0xff] }
 0x197   : > { %2054 = vmatprep.subr.bf16.mxu0 %v2888_v1  ;;  %v2097_v22 = vpack.c.bf16 %v854_v21, %v853_v20  ;;  %v1050_v21 = vld [vmem:[#allocation14] sm:$0xff] }
 0x19a   : > { %2056 = vmatpush3.bf16.msra.mxu0 %v2055_v23  ;;  %v855_v23 = vld [vmem:[#allocation10 + $0x140] sm:$0xff] }
 0x19b   : > { %2057 = vmatprep.subr.bf16.mxu0 %v2888_v1  ;;  %v2100_v25 = vpack.c.bf16 %v856_v24, %v855_v23 }
 0x19e   : > { %2059 = vmatpush3.bf16.msra.mxu0 %v2058_v26  ;;  %v857_v26 = vld [vmem:[#allocation10 + $0x150] sm:$0xff] }
 0x19f   : > { %2060 = vmatprep.subr.bf16.mxu0 %v2888_v1  ;;  %v2103_v28 = vpack.c.bf16 %v858_v27, %v857_v26 }
 0x1a2   : > { %2062 = vmatpush3.bf16.msra.mxu0 %v2061_v29  ;;  %v859_v29 = vld [vmem:[#allocation10 + $0x160] sm:$0xff] }
 0x1a3   : > { %2063 = vmatprep.subr.bf16.mxu0 %v2888_v1 }
 0x202   : > { %v3482_v31 = vpop.permute.xlu0 %625 }
 0x203   : > { %v3488_v33 = vpop.permute.xlu1 %635  ;;  %v3500_v36 = vmul.f32 %v3482_v31, %v3486_v32 }
 0x204   : > { %v3492_v34 = vmul.f32 %v3488_v33, %v3480_v30 }
 0x205   : > { %v864_v43 = vrot.slane %v3500_v36, 2  ;;  %v678_v45 = vrot.slane %v3500_v36, 1 }
 0x206   : > { %v3502_v39 = vpop.permute.xlu0 %630  ;;  %v867_v41 = vrot.slane %v3492_v34, 2  ;;  %v681_v50 = vrot.slane %v3492_v34, 1 }
 0x207   : > { %v3506_v40 = vmul.f32 %v3502_v39, %v3496_v35 }
 0x209   : > { %v865_v44 = vrot.slane %v3506_v40, 2  ;;  %v679_v46 = vrot.slane %v3506_v40, 1 }
 0x20b   : > { %v680_v49 = vsel %vm677_vm2, %v678_v45, %v679_v46  ;;  %v3516_v51 = vsel %vm863_vm1, %v864_v43, %v865_v44  ;;  %v3521_v52 = vsel %vm863_vm1, %v865_v44, %v867_v41  ;;  %v682_v56 = vsel %vm677_vm2, %v679_v46, %v681_v50 }
 0x20c   : > { %1844 = vmatmul.mubr.f32.vlgmr.msra.gmra.mrb[0].mxu0 %v680_v49 }
 0x20d   : > { %2065 = vmatpush3.bf16.msra.mxu0 %v2064_v42  ;;  %1846 = vmatprep.mubr.msk.f32.mxu0 %vm2889_vm0, %v2890_v14 }
 0x20e   : > { %2066 = vmatprep.subr.bf16.mxu0 %v2888_v1 }
 0x210   : > { %1847 = vmatmul.mubr.f32.gmra.mrb[2].mxu0 %v682_v56 }
 0x211   : > { %2068 = vmatpush3.bf16.msra.mxu0 %v2067_v53  ;;  %1849 = vmatprep.mubr.msk.f32.mxu0 %vm2889_vm0, %v2890_v14 }
 0x212   : > { %2069 = vmatprep.subr.bf16.mxu0 %v2888_v1 }
 0x214   : > { %1850 = vmatmul.mubr.f32.gmra.mrb[4].mxu0 %v681_v50 }
 0x215   : > { %2071 = vmatpush3.bf16.msra.mxu0 %v2070_v57  ;;  %1884 = vmatprep.mubr.msk.f32.mxu0 %vm2889_vm0, %v2890_v14 }
 0x216   : > { %2072 = vmatprep.subr.bf16.mxu0 %v2888_v1 }
 0x219   : > { %2074 = vmatpush3.bf16.msra.mxu0 %v2073_v60  ;;  %v1068_v60 = vld [vmem:[#allocation14 + $0x88] sm:$0xff] }
 0x21a   : > { %2075 = vmatprep.subr.bf16.mxu0 %v2888_v1  ;;  %v2111_v61 = vpack.c.bf16 %v1068_v60, %v1067_v59 }
 0x21c   : > { %2112 = vmatprep.subr.bf16.mxu1 %v2111_v61 }
 0x21d   : > { %2077 = vmatpush3.bf16.msra.mxu0 %v2076_v63  ;;  %2114 = vmatpush3.bf16.msra.mxu1 %v2111_v61  ;;  %v1070_v63 = vld [vmem:[#allocation14 + $0x98] sm:$0xff] }
 0x21e   : > { %2078 = vmatprep.subr.bf16.mxu0 %v2888_v1  ;;  %v2115_v2 = vpack.c.bf16 %v1070_v63, %v1069_v62 }
 0x220   : > { %2116 = vmatprep.subr.bf16.mxu1 %v2115_v2 }
 0x221   : > { %2080 = vmatpush3.bf16.msra.mxu0 %v2079_v3  ;;  %v1072_v3 = vld [vmem:[#allocation14 + $0xa8] sm:$0xff]  ;;  %2118 = vmatpush3.bf16.msra.mxu1 %v2115_v2 }
 0x222   : > { %2081 = vmatprep.subr.bf16.mxu0 %v2888_v1  ;;  %v2119_v4 = vpack.c.bf16 %v1072_v3, %v1071_v0 }
 0x224   : > { %2120 = vmatprep.subr.bf16.mxu1 %v2119_v4 }
 0x225   : > { %2083 = vmatpush3.bf16.msra.mxu0 %v2082_v6  ;;  %v1074_v6 = vld [vmem:[#allocation14 + $0xb8] sm:$0xff]  ;;  %2122 = vmatpush3.bf16.msra.mxu1 %v2119_v4 }
 0x226   : > { %2084 = vmatprep.subr.bf16.mxu0 %v2888_v1  ;;  %v2123_v7 = vpack.c.bf16 %v1074_v6, %v1073_v5  ;;  %v1040_v6 = vrot.slane %v3502_v39, 1 }
 0x228   : > { %2124 = vmatprep.subr.bf16.mxu1 %v2123_v7 }
 0x229   : > { %2086 = vmatpush3.bf16.msra.mxu0 %v2085_v9  ;;  %v1076_v9 = vld [vmem:[#allocation14 + $0xc8] sm:$0xff]  ;;  %2126 = vmatpush3.bf16.msra.mxu1 %v2123_v7 }
 0x22a   : > { %2087 = vmatprep.subr.bf16.mxu0 %v2888_v1  ;;  %v2127_v10 = vpack.c.bf16 %v1076_v9, %v1075_v8  ;;  %v1039_v9 = vrot.slane %v3482_v31, 1 }
 0x22c   : > { %1885 = vmatmul.mubr.f32.vlgmr.msra.gmra.mrb[0].mxu0 %v3500_v36  ;;  %v860_v36 = vld [vmem:[#allocation10 + $0x168] sm:$0xff]  ;;  %2128 = vmatprep.subr.bf16.mxu1 %v2127_v10 }
 0x22d   : > { %2089 = vmatpush3.bf16.msra.mxu0 %v2088_v12  ;;  %1887 = vmatprep.mubr.msk.f32.mxu0 %vm2889_vm0, %v2890_v14  ;;  %v2106_v37 = vpack.c.bf16 %v860_v36, %v859_v29  ;;  %v1078_v12 = vld [vmem:[#allocation14 + $0xd8] sm:$0xff] }
 0x22e   : > { %2090 = vmatprep.subr.bf16.mxu0 %v2888_v1  ;;  %v2131_v13 = vpack.c.bf16 %v1078_v12, %v1077_v11  ;;  %2130 = vmatpush3.bf16.msra.mxu1 %v2127_v10  ;;  %v1042_v10 = vrot.slane %v3488_v33, 1 }
 0x230   : > { %1888 = vmatmul.mubr.f32.gmra.mrb[2].mxu0 %v3506_v40  ;;  %v862_v40 = vld [vmem:[#allocation10 + $0x178] sm:$0xff]  ;;  %2132 = vmatprep.subr.bf16.mxu1 %v2131_v13 }
 0x231   : > { %2092 = vmatpush3.bf16.msra.mxu0 %v2091_v16  ;;  %1890 = vmatprep.mubr.msk.f32.mxu0 %vm2889_vm0, %v2890_v14  ;;  %v2109_v42 = vpack.c.bf16 %v862_v40, %v861_v38  ;;  %v1080_v16 = vld [vmem:[#allocation14 + $0xe8] sm:$0xff] }
 0x232   : > { %2093 = vmatprep.subr.bf16.mxu0 %v2888_v1  ;;  %v2135_v17 = vpack.c.bf16 %v1080_v16, %v1079_v15  ;;  %2134 = vmatpush3.bf16.msra.mxu1 %v2131_v13  ;;  %v1041_v13 = vsel %vm677_vm2, %v1039_v9, %v1040_v6  ;;  %v1256_v9 = vld [vmem:[#allocation14 + $0x160] sm:$0xff] }
 0x234   : > { %1891 = vmatmul.mubr.f32.gmra.mrb[4].mxu0 %v3492_v34  ;;  %2136 = vmatprep.subr.bf16.mxu1 %v2135_v17 }
 0x235   : > { %2095 = vmatpush3.bf16.msra.mxu0 %v2094_v19  ;;  %1925 = vmatprep.mubr.msk.f32.mxu0 %vm2889_vm0, %v2890_v14  ;;  %v1082_v19 = vld [vmem:[#allocation14 + $0xf8] sm:$0xff] }
 0x236   : > { %2096 = vmatprep.subr.bf16.mxu0 %v2888_v1  ;;  %2138 = vmatpush3.bf16.msra.mxu1 %v2135_v17  ;;  %v2139_v20 = vpack.c.bf16 %v1082_v19, %v1081_v18  ;;  %v1043_v17 = vsel %vm677_vm2, %v1040_v6, %v1042_v10  ;;  %v1254_v6 = vld [vmem:[#allocation14 + $0x150] sm:$0xff] }
 0x238   : > { %2140 = vmatprep.subr.bf16.mxu1 %v2139_v20 }
 0x239   : > { %2098 = vmatpush3.bf16.msra.mxu0 %v2097_v22  ;;  %v1051_v22 = vld [vmem:[#allocation14 + $0x8] sm:$0xff] }
 0x23a   : > { %2099 = vmatprep.subr.bf16.mxu0 %v2888_v1  ;;  %v3576_v23 = vpack.c.bf16 %v1051_v22, %v1050_v21  ;;  %2142 = vmatpush3.bf16.msra.mxu1 %v2139_v20 }
 0x23c   : > { %2144 = vmatprep.subr.bf16.mxu1 %v3576_v23 }
 0x23d   : > { %2101 = vmatpush3.bf16.msra.mxu0 %v2100_v25 }
 0x23e   : > { %2102 = vmatprep.subr.bf16.mxu0 %v2888_v1 }
 0x241   : > { %2104 = vmatpush3.bf16.msra.mxu0 %v2103_v28 }
 0x242   : > { %2105 = vmatprep.subr.bf16.mxu0 %v2888_v1 }
 0x245   : > { %2107 = vmatpush3.bf16.msra.mxu0 %v2106_v37 }
 0x246   : > { %2108 = vmatprep.subr.bf16.mxu0 %v2888_v1 }
 0x249   : > { %2110 = vmatpush3.bf16.msra.mxu0 %v2109_v42  ;;  %v1690_v42 = vld [vmem:[#allocation11] ss:$0 sm:$0xff] }
 0x24c   : > { %1926 = vmatmul.mubr.f32.vlgmr.msra.gmra.mrb[0].mxu0 %v3516_v51 }
 0x24d   : > { %1928 = vmatprep.mubr.msk.f32.mxu0 %vm2889_vm0, %v2890_v14 }
 0x250   : > { %1929 = vmatmul.mubr.f32.gmra.mrb[2].mxu0 %v3521_v52 }
 0x251   : > { %1931 = vmatprep.mubr.msk.f32.mxu0 %vm2889_vm0, %v2890_v14 }
 0x254   : > { %1932 = vmatmul.mubr.f32.gmra.mrb[4].mxu0 %v867_v41 }
 0x31f   : > { %v938_v43 = vpop.f32.mrb[0].mxu0 }
 0x320   : > { %957 = vadd.xlane.f32.xlu1 %v938_v43  ;;  %v1927_v44 = vpop.f32.mrb[1].mxu0 }
 0x321   : > { %v1691_v44 = vld [vmem:[#allocation13] ss:$0 sm:$0xff] }
 0x323   : > { %v943_v45 = vpop.f32.mrb[2].mxu0 }
 0x324   : > { %959 = vadd.xlane.f32.xlu0 %v943_v45  ;;  %v1930_v1 = vpop.f32.mrb[3].mxu0 }
 0x327   : > { %v948_v46 = vpop.f32.mrb[4].mxu0 }
 0x328   : > { %v1933_v47 = vpop.f32.mrb[5].mxu0  ;;  %v962_v48 = vsel %vm961_vm3, %v948_v46, 0.0 }
 0x329   : > { %963 = vadd.xlane.f32.xlu0 %v962_v48 }
 0x3ad   : > { %v958_v49 = vpop.xlane.xlu1 %957 }
 0x3ae   : > { %v966_v50 = vmul.f32 0.0078125, %v958_v49 }
 0x3b0   : > { %v3563_v51 = vsub.f32 %v938_v43, %v966_v50 }
 0x3b1   : > { %v960_v14 = vpop.xlane.xlu0 %959 }
 0x3b2   : > { %v967_v52 = vmul.f32 0.0078125, %v960_v14  ;;  %v972_v34 = vmul.f32 %v3563_v51, %v3563_v51 }
 0x3b4   : > { %v3567_v41 = vsub.f32 %v943_v45, %v967_v52  ;;  %975 = vadd.xlane.f32.xlu1 %v972_v34 }
 0x3b6   : > { %v964_v53 = vpop.xlane.xlu0 %963  ;;  %v973_v54 = vmul.f32 %v3567_v41, %v3567_v41 }
 0x3b7   : > { %v968_v55 = vmul.f32 0.0078125, %v964_v53 }
 0x3b8   : > { %977 = vadd.xlane.f32.xlu0 %v973_v54 }
 0x3b9   : > { %v3571_v56 = vsub.f32 %v948_v46, %v968_v55 }
 0x3bb   : > { %v974_v57 = vmul.f32 %v3571_v56, %v3571_v56 }
 0x3bd   : > { %v979_v58 = vsel %vm961_vm3, %v974_v57, 0.0 }
 0x3be   : > { %980 = vadd.xlane.f32.xlu1 %v979_v58 }
 0x441   : > { %v976_v24 = vpop.xlane.xlu1 %975 }
 0x442   : > { %v982_v25 = vmul.f32 0.0078125, %v976_v24 }
 0x444   : > { %v985_v26 = vadd.f32 1e-05, %v982_v25  ;;  %v1052_v25 = vld [vmem:[#allocation14 + $0x10] sm:$0xff] }
 0x445   : > { %v978_v27 = vpop.xlane.xlu0 %977 }
 0x446   : > { %2413 = vrsqrt.f32 %v985_v26  ;;  %v983_v28 = vmul.f32 0.0078125, %v978_v27  ;;  %v1053_v26 = vld [vmem:[#allocation14 + $0x18] sm:$0xff] }
 0x448   : > { %v986_v29 = vadd.f32 1e-05, %v983_v28  ;;  %v2147_v28 = vpack.c.bf16 %v1053_v26, %v1052_v25 }
 0x44a   : > { %2415 = vrsqrt.f32 %v986_v29 }
 0x44b   : > { %v981_v36 = vpop.xlane.xlu1 %980 }
 0x44c   : > { %v984_v37 = vmul.f32 0.0078125, %v981_v36  ;;  %v1054_v36 = vld [vmem:[#allocation14 + $0x20] sm:$0xff] }
 0x44e   : > { %v987_v38 = vadd.f32 1e-05, %v984_v37  ;;  %v1055_v37 = vld [vmem:[#allocation14 + $0x28] sm:$0xff] }
 0x450   : > { %v2414_v40 = vpop.eup %2413  ;;  %2417 = vrsqrt.f32 %v987_v38  ;;  %v2151_v38 = vpack.c.bf16 %v1055_v37, %v1054_v36 }
 0x451   : > { %v991_v43 = vmul.f32 %v2414_v40, %v3563_v51  ;;  %v1056_v40 = vld [vmem:[#allocation14 + $0x30] sm:$0xff] }
 0x453   : > { %v1000_v45 = vmul.f32 %v1690_v42, %v991_v43 }
 0x454   : > { %v2416_v1 = vpop.eup %2415 }
 0x455   : > { %v1009_v46 = vadd.f32 %v1691_v44, %v1000_v45  ;;  %v992_v47 = vmul.f32 %v2416_v1, %v3567_v41  ;;  %v1059_v45 = vld [vmem:[#allocation14 + $0x48] sm:$0xff] }
 0x457   : > { %v1001_v48 = vmul.f32 %v1690_v42, %v992_v47  ;;  %v1015_v49 = vmul.f32 %v1009_v46, %v1009_v46  ;;  %v1061_v47 = vld [vmem:[#allocation14 + $0x58] sm:$0xff] }
 0x459   : > { %v1010_v50 = vadd.f32 %v1691_v44, %v1001_v48  ;;  %v1018_v14 = vmul.f32 %v1015_v49, %v1009_v46  ;;  %v1063_v49 = vld [vmem:[#allocation14 + $0x68] sm:$0xff] }
 0x45a   : > { %v2418_v52 = vpop.eup %2417 }
 0x45b   : > { %v993_v34 = vmul.f32 %v2418_v52, %v3571_v56  ;;  %v1016_v53 = vmul.f32 %v1010_v50, %v1010_v50  ;;  %v1021_v54 = vmul.f32 0.044715, %v1018_v14  ;;  %v1012_v56 = vmul.f32 0.5, %v1009_v46  ;;  %v1064_v14 = vld [vmem:[#allocation14 + $0x70] sm:$0xff]  ;;  %v1065_v52 = vld [vmem:[#allocation14 + $0x78] sm:$0xff] }
 0x45c   : > { %v1013_v11 = vmul.f32 0.5, %v1010_v50 }
 0x45d   : > { %v1002_v55 = vmul.f32 %v1690_v42, %v993_v34  ;;  %v1019_v57 = vmul.f32 %v1016_v53, %v1010_v50  ;;  %v1024_v58 = vadd.f32 %v1021_v54, %v1009_v46  ;;  %v1057_v42 = vld [vmem:[#allocation14 + $0x38] sm:$0xff]  ;;  %v1060_v46 = vld [vmem:[#allocation14 + $0x50] sm:$0xff]  ;;  %v2171_v34 = vpack.c.bf16 %v1065_v52, %v1064_v14  ;;  %v1244_v53 = vld [vmem:[#allocation14 + $0x100] sm:$0xff] }
 0x45e   : > { %v2155_v43 = vpack.c.bf16 %v1057_v42, %v1056_v40  ;;  %v2163_v48 = vpack.c.bf16 %v1061_v47, %v1060_v46  ;;  %v1245_v54 = vld [vmem:[#allocation14 + $0x108] sm:$0xff]  ;;  %v1390_v40 = vrot.slane %v3480_v30, 2  ;;  %v1388_v42 = vrot.slane %v3496_v35, 2  ;;  %v1693_v46 = vld [vmem:[#allocation17] ss:$0 sm:$0xff] }
 0x45f   : > { %v1011_v59 = vadd.f32 %v1691_v44, %v1002_v55  ;;  %v1022_v51 = vmul.f32 0.044715, %v1019_v57  ;;  %v1027_v60 = vmul.f32 0.7978846, %v1024_v58  ;;  %v1058_v44 = vld [vmem:[#allocation14 + $0x40] sm:$0xff]  ;;  %v2175_v55 = vpack.c.bf16 %v1245_v54, %v1244_v53  ;;  %v1246_v57 = vld [vmem:[#allocation14 + $0x110] sm:$0xff] }
 0x460   : > { %v2159_v1 = vpack.c.bf16 %v1059_v45, %v1058_v44  ;;  %v1247_v58 = vld [vmem:[#allocation14 + $0x118] sm:$0xff]  ;;  %v1387_v45 = vrot.slane %v3486_v32, 2 }
 0x461   : > { %v1025_v61 = vadd.f32 %v1022_v51, %v1010_v50  ;;  %2419 = vtanh.f32 %v1027_v60  ;;  %v1017_v62 = vmul.f32 %v1011_v59, %v1011_v59  ;;  %v1014_v21 = vmul.f32 0.5, %v1011_v59 }
 0x462   : > { %v2179_v60 = vpack.c.bf16 %v1247_v58, %v1246_v57 }
 0x463   : > { %v1028_v63 = vmul.f32 0.7978846, %v1025_v61  ;;  %v1020_v41 = vmul.f32 %v1017_v62, %v1011_v59  ;;  %v1248_v61 = vld [vmem:[#allocation14 + $0x120] sm:$0xff]  ;;  %v1249_v62 = vld [vmem:[#allocation14 + $0x128] sm:$0xff] }
 0x465   : > { %2421 = vtanh.f32 %v1028_v63  ;;  %v1023_v0 = vmul.f32 0.044715, %v1020_v41  ;;  %v2183_v41 = vpack.c.bf16 %v1249_v62, %v1248_v61 }
 0x467   : > { %v1026_v2 = vadd.f32 %v1023_v0, %v1011_v59  ;;  %v1250_v0 = vld [vmem:[#allocation14 + $0x130] sm:$0xff] }
 0x469   : > { %v1029_v3 = vmul.f32 0.7978846, %v1026_v2  ;;  %v1251_v2 = vld [vmem:[#allocation14 + $0x138] sm:$0xff] }
 0x46b   : > { %v2420_v4 = vpop.eup %2419  ;;  %2423 = vtanh.f32 %v1029_v3  ;;  %v2187_v3 = vpack.c.bf16 %v1251_v2, %v1250_v0 }
 0x46c   : > { %v1033_v5 = vadd.f32 1.0, %v2420_v4  ;;  %v1252_v4 = vld [vmem:[#allocation14 + $0x140] sm:$0xff] }
 0x46e   : > { %v1036_v7 = vmul.f32 %v1033_v5, %v1012_v56  ;;  %v1253_v56 = vld [vmem:[#allocation14 + $0x148] sm:$0xff] }
 0x46f   : > { %v2422_v8 = vpop.eup %2421  ;;  %v2191_v5 = vpack.c.bf16 %v1253_v56, %v1252_v4 }
 0x470   : > { %v1034_v12 = vadd.f32 1.0, %v2422_v8  ;;  %v3586_v16 = vmul.f32 %v1041_v13, %v1036_v7  ;;  %v1255_v7 = vld [vmem:[#allocation14 + $0x158] sm:$0xff] }
 0x471   : > { %v2195_v8 = vpack.c.bf16 %v1255_v7, %v1254_v6  ;;  %v1259_v13 = vld [vmem:[#allocation14 + $0x178] sm:$0xff] }
 0x472   : > { %v1037_v15 = vmul.f32 %v1034_v12, %v1013_v11  ;;  %v1086_v39 = vrot.slane %v3586_v16, 1  ;;  %v1260_v51 = vrot.slane %v3586_v16, 2  ;;  %v1258_v12 = vld [vmem:[#allocation14 + $0x170] sm:$0xff] }
 0x474   : > { %v3589_v18 = vmul.f32 %v1043_v17, %v1037_v15  ;;  %v2203_v15 = vpack.c.bf16 %v1259_v13, %v1258_v12 }
 0x475   : > { %v2424_v19 = vpop.eup %2423 }
 0x476   : > { %v1087_v20 = vrot.slane %v3589_v18, 1  ;;  %v1035_v31 = vadd.f32 1.0, %v2424_v19  ;;  %v1261_v59 = vrot.slane %v3589_v18, 2 }
 0x478   : > { %v1088_v33 = vsel %vm677_vm2, %v1086_v39, %v1087_v20  ;;  %v1038_v22 = vmul.f32 %v1035_v31, %v1014_v21  ;;  %v1262_v63 = vsel %vm863_vm1, %v1260_v51, %v1261_v59 }
 0x479   : > { %1966 = vmatprep.mubr.f32.mxu1 %v1088_v33 }
 0x47a   : > { %v3594_v24 = vmul.f32 %v1042_v10, %v1038_v22  ;;  %v1257_v10 = vld [vmem:[#allocation14 + $0x168] sm:$0xff] }
 0x47b   : > { %v2199_v11 = vpack.c.bf16 %v1257_v10, %v1256_v9 }
 0x47c   : > { %v1089_v27 = vrot.slane %v3594_v24, 1 }
 0x47e   : > { %v1090_v29 = vsel %vm677_vm2, %v1087_v20, %v1089_v27 }
 0x47f   : > { %1967 = vmatmul.mubr.f32.vlgmr.msra.gmra.mrb[0].mxu1 %v1090_v29 }
 0x480   : > { %2146 = vmatpush3.bf16.msra.mxu1 %v3576_v23  ;;  %2001 = vmatprep.mubr.f32.mxu1 %v3586_v16  ;;  %v1062_v23 = vld [vmem:[#allocation14 + $0x60] sm:$0xff]  ;;  %v1263_v16 = vrot.slane %v3594_v24, 2 }
 0x481   : > { %2148 = vmatprep.subr.bf16.mxu1 %v2147_v28  ;;  %v2167_v50 = vpack.c.bf16 %v1063_v49, %v1062_v23  ;;  %v1391_v23 = vsel %vm863_vm1, %v1388_v42, %v1390_v40 }
 0x482   : > { %v1264_v17 = vsel %vm863_vm1, %v1261_v59, %v1263_v16 }
 0x484   : > { %2150 = vmatpush3.bf16.msra.mxu1 %v2147_v28 }
 0x485   : > { %2152 = vmatprep.subr.bf16.mxu1 %v2151_v38 }
 0x488   : > { %2154 = vmatpush3.bf16.msra.mxu1 %v2151_v38 }
 0x489   : > { %2156 = vmatprep.subr.bf16.mxu1 %v2155_v43 }
 0x48c   : > { %2158 = vmatpush3.bf16.msra.mxu1 %v2155_v43  ;;  %v1692_v43 = vld [vmem:[#allocation16] ss:$0 sm:$0xff] }
 0x48d   : > { %2160 = vmatprep.subr.bf16.mxu1 %v2159_v1 }
 0x490   : > { %2162 = vmatpush3.bf16.msra.mxu1 %v2159_v1 }
 0x491   : > { %2164 = vmatprep.subr.bf16.mxu1 %v2163_v48 }
 0x494   : > { %2166 = vmatpush3.bf16.msra.mxu1 %v2163_v48 }
 0x495   : > { %2168 = vmatprep.subr.bf16.mxu1 %v2167_v50 }
 0x498   : > { %2170 = vmatpush3.bf16.msra.mxu1 %v2167_v50  ;;  %v1389_v50 = vsel %vm863_vm1, %v1387_v45, %v1388_v42 }
 0x499   : > { %2172 = vmatprep.subr.bf16.mxu1 %v2171_v34 }
 0x49c   : > { %2174 = vmatpush3.bf16.msra.mxu1 %v2171_v34 }
 0x49d   : > { %2176 = vmatprep.subr.bf16.mxu1 %v2175_v55 }
 0x49f   : > { %2002 = vmatmul.mubr.f32.vlgmr.msra.gmra.mrb[0].mxu1 %v3589_v18 }
 0x4a0   : > { %2178 = vmatpush3.bf16.msra.mxu1 %v2175_v55  ;;  %2036 = vmatprep.mubr.f32.mxu1 %v1262_v63 }
 0x4a1   : > { %2180 = vmatprep.subr.bf16.mxu1 %v2179_v60 }
 0x4a4   : > { %2182 = vmatpush3.bf16.msra.mxu1 %v2179_v60 }
 0x4a5   : > { %2184 = vmatprep.subr.bf16.mxu1 %v2183_v41 }
 0x4a8   : > { %2186 = vmatpush3.bf16.msra.mxu1 %v2183_v41 }
 0x4a9   : > { %2188 = vmatprep.subr.bf16.mxu1 %v2187_v3 }
 0x4ac   : > { %2190 = vmatpush3.bf16.msra.mxu1 %v2187_v3 }
 0x4ad   : > { %2192 = vmatprep.subr.bf16.mxu1 %v2191_v5 }
 0x4b0   : > { %2194 = vmatpush3.bf16.msra.mxu1 %v2191_v5 }
 0x4b1   : > { %2196 = vmatprep.subr.bf16.mxu1 %v2195_v8 }
 0x4b4   : > { %2198 = vmatpush3.bf16.msra.mxu1 %v2195_v8 }
 0x4b5   : > { %2200 = vmatprep.subr.bf16.mxu1 %v2199_v11 }
 0x4b8   : > { %2202 = vmatpush3.bf16.msra.mxu1 %v2199_v11 }
 0x4b9   : > { %2204 = vmatprep.subr.bf16.mxu1 %v2203_v15 }
 0x4bc   : > { %2206 = vmatpush3.bf16.msra.mxu1 %v2203_v15 }
 0x4bf   : > { %2037 = vmatmul.mubr.f32.vlgmr.msra.gmra.mrb[0].mxu1 %v1264_v17 }
 0x592   : > { %v2038_v18 = vpop.f32.mrb[0].mxu1 }
 0x593   : > { %1348 = vadd.xlane.f32.xlu1 %v2038_v18  ;;  %v1333_v19 = vpop.f32.mrb[1].mxu1 }
 0x594   : > { %1346 = vadd.xlane.f32.xlu0 %v1333_v19 }
 0x620   : > { %v1349_v39 = vpop.xlane.xlu1 %1348 }
 0x621   : > { %v1351_v20 = vmul.f32 0.0078125, %v1349_v39  ;;  %v1347_v21 = vpop.xlane.xlu0 %1346 }
 0x622   : > { %v1350_v31 = vmul.f32 0.0078125, %v1347_v21 }
 0x623   : > { %v1353_v33 = vsub.f32 %v2038_v18, %v1351_v20 }
 0x624   : > { %v1352_v22 = vsub.f32 %v1333_v19, %v1350_v31 }
 0x625   : > { %v1355_v25 = vmul.f32 %v1353_v33, %v1353_v33 }
 0x626   : > { %v1354_v26 = vmul.f32 %v1352_v22, %v1352_v22 }
 0x627   : > { %1358 = vadd.xlane.f32.xlu1 %v1355_v25 }
 0x628   : > { %1356 = vadd.xlane.f32.xlu0 %v1354_v26 }
 0x6b4   : > { %v1359_v27 = vpop.xlane.xlu1 %1358 }
 0x6b5   : > { %v1361_v24 = vmul.f32 0.0078125, %v1359_v27  ;;  %v1357_v28 = vpop.xlane.xlu0 %1356 }
 0x6b6   : > { %v1360_v29 = vmul.f32 0.0078125, %v1357_v28 }
 0x6b7   : > { %v1363_v36 = vadd.f32 1e-05, %v1361_v24 }
 0x6b8   : > { %v1362_v37 = vadd.f32 1e-05, %v1360_v29 }
 0x6b9   : > { %2425 = vrsqrt.f32 %v1363_v36 }
 0x6ba   : > { %2427 = vrsqrt.f32 %v1362_v37 }
 0x6c3   : > { %v2426_v38 = vpop.eup %2425 }
 0x6c4   : > { %v2428_v44 = vpop.eup %2427  ;;  %v1367_v1 = vmul.f32 %v2426_v38, %v1353_v33 }
 0x6c5   : > { %v1366_v47 = vmul.f32 %v2428_v44, %v1352_v22 }
 0x6c6   : > { %v1375_v48 = vmul.f32 %v1692_v43, %v1367_v1 }
 0x6c7   : > { %v1374_v49 = vmul.f32 %v1692_v43, %v1366_v47 }
 0x6c8   : > { %v1383_v14 = vadd.f32 %v1693_v46, %v1375_v48 }
 0x6c9   : > { %v1382_v52 = vadd.f32 %v1693_v46, %v1374_v49 }
 0x6ca   : > { %v1395_v30 = vadd.f32 %v1391_v23, %v1383_v14 }
 0x6cb   : > { %v1394_v34 = vadd.f32 %v1389_v50, %v1382_v52 }
 0x6cc   : > { %v1399_v35 = vmul.f32 %v1395_v30, %v1395_v30  ;;  %v1397_v63 = vmul.f32 0.5, %v1395_v30 }
 0x6cd   : > { %v1398_v53 = vmul.f32 %v1394_v34, %v1394_v34  ;;  %v1396_v0 = vmul.f32 0.5, %v1394_v34 }
 0x6ce   : > { %v1401_v54 = vmul.f32 %v1399_v35, %v1395_v30 }
 0x6cf   : > { %v1400_v32 = vmul.f32 %v1398_v53, %v1394_v34 }
 0x6d0   : > { %v1403_v55 = vmul.f32 0.044715, %v1401_v54 }
 0x6d1   : > { %v1402_v57 = vmul.f32 0.044715, %v1400_v32 }
 0x6d2   : > { %v1405_v58 = vadd.f32 %v1403_v55, %v1395_v30 }
 0x6d3   : > { %v1404_v59 = vadd.f32 %v1402_v57, %v1394_v34 }
 0x6d4   : > { %v1407_v51 = vmul.f32 0.7978846, %v1405_v58 }
 0x6d5   : > { %v1406_v60 = vmul.f32 0.7978846, %v1404_v59 }
 0x6d6   : > { %2429 = vtanh.f32 %v1407_v51 }
 0x6d7   : > { %2431 = vtanh.f32 %v1406_v60 }
 0x6e0   : > { %v2430_v61 = vpop.eup %2429 }
 0x6e1   : > { %v2432_v62 = vpop.eup %2431  ;;  %v1411_v41 = vadd.f32 1.0, %v2430_v61 }
 0x6e2   : > { %v1410_v2 = vadd.f32 1.0, %v2432_v62 }
 0x6e3   : > { %v1413_v3 = vmul.f32 %v1411_v41, %v1397_v63 }
 0x6e4   : > { %v1412_v4 = vmul.f32 %v1410_v2, %v1396_v0 }
 0x6e5   : > { %1415 = vst [vmem:[%s609_s9 + $0x8] sm:$0xff] %v1413_v3 }
 0x6e6   : > { %1414 = vst [vmem:[%s609_s9] sm:$0xff] %v1412_v4 }
 0x6e7   : > { %2736 = shalt.err (!%p2733_p5)
}
 0x6e8   : > { %s2737_s21 = scalar_lea.hbm %s3617_s17, 256  ;;  %s2741_s28 = scalar_lea.hbm %s3792_s25, 1024 }
 0x6e9   : > { %p2738_p13 = scmp.ne.s32.totalorder %s3617_s17, %s2737_s21  ;;  %p2742_p0 = scmp.lt.u32.totalorder %s3617_s17, %s3792_s25 }
 0x6ea   : > { %p2743_p7 = scmp.lt.u32.totalorder %s2741_s28, %s2737_s21  ;;  %p2745_p11 = scmp.lt.u32.totalorder %s2737_s21, %s3617_s17 }
 0x6eb   : > { %p2739_p1 = pnand %p2738_p13, %p3793_p2 }
 0x6ec   : > { %p2744_p6 = por %p2743_p7, %p2742_p0 }
 0x6ed   : > { %p2740_p9 = pneg %p2739_p1 }
 0x6ee   : > { %p2746_p10 = por %p2745_p11, %p2744_p6 }
 0x6f0   : > { %p2747_p8 = pnand %p2746_p10, %p2740_p9 }
 0x6f2   : > { %2750 = shalt.err (!%p2747_p8)
}
 0x6f3   : > { %s2892_s0 = smov 128   ;;  %s2893_s6 = smov 8  }
 0x6f4   : > { %2257 = dma.vmem_to_hbm [thread:$0]  (%p3793_p2), %s3619_s3, 256, %s3617_s17, %s1417_s8, %s2892_s0, %s2892_s0, %s2893_s6  }
 0x6f5 PF: > { %s3794_s5 = sld [smem:[#allocation29_spill]]  ;;  %p2308_p4 = scmp.ge.s32.totalorder %s2873_s23, 2 }
 0x6f6   : > { %p3795_p3 = scmp.ne.s32.totalorder %s3767_s29, 0 }
 0x6f8   : > { %p2292_p12 = pnand %p2308_p4, %p3795_p3 }
 0x6fb   : > { %s1447_s26 = sand.u32 1, %s3794_s5  }
 0x6fc   : > { %s1448_s9 = scalar_lea.sflag [#allocation4], %s1447_s26 }
 0x6fd   : > { %2828 = dma.done.wait (!%p2292_p12), %s1448_s9, 256  }
 0x6fe   : > { %2830 = vsyncadd (!%p2292_p12), %s1448_s9, 4294967040  ;;  %s35_s23 = sadd.s32 1, %s2873_s23   ;;  %s3796_s16 = sld [smem:[#allocation30_spill]] }
 0x6ff   : > { %p32_p5 = scmp.ge.s32.totalorder %s35_s23, 6   ;;  %s3797_s17 = sld [smem:[#allocation31_spill]] }
 0x700   : > { %s3798_s18 = sld [smem:[#allocation39_spill]]  ;;  %s3799_s19 = sld [smem:[#allocation34_spill]] }
 0x701   : > { %s3800_s20 = sld [smem:[#allocation35_spill]]  ;;  %s3801_s21 = sld [smem:[#allocation37_spill]] }
 0x702   : > { %s3802_s22 = sld [smem:[#allocation38_spill]]  ;;  %s3803_s13 = smov %s2837_s14 }
 0x703   : > { %s3804_s14 = smov %s2841_s15  ;;  %s3805_s15 = smov %s3143_s11 }
 0x704   :  { %34 = sbr.rel (!%p32_p5) target bundleno = 28 (0x1c), region = 170 }
 0x70b   :  { %1453 = vsyncpa [#allocation3], 1 }
 0x70c   :  { %1455 = vsyncpa [#allocation3 + $0x1], 1 }
 0x70d   :  { %1456 = vsyncpa [#allocation6], 1 }
 0x70e   :  { %1458 = vsyncpa [#allocation6 + $0x1], 1 }
 0x70f   :  { %1459 = vsyncpa [#allocation9], 1 }
 0x710   :  { %1461 = vsyncpa [#allocation9 + $0x1], 1 }
 0x711   :  { %1462 = vsyncpa [#allocation12], 1 }
 0x712   :  { %1463 = vsyncpa [#allocation15], 1 }
 0x713   :  { %1464 = vsyncpa [#allocation18], 1 }
 0x714   :  { %1465 = vsyncpa [#allocation4], 1 }
 0x715   :  { %1467 = vsyncpa [#allocation4 + $0x1], 1 }

</bundles_post_ra>
